<compile_context>
chip_gen: v6e
topology: v6e:2x2x1
jax: 0.10.0
libtpu: 0.0.40
codegen_flags: <defaults>
</compile_context>

<pallas_src>
import jax
import jax.numpy as jnp
from jax.experimental import pallas as pl
from jax.experimental.pallas import tpu as pltpu

# ----------------------------- small synthetic ViT config -----------------------------
NUM_CLASSES = 4
HIDDEN = 32
NUM_HEADS = 4
HEAD_DIM = HIDDEN // NUM_HEADS
MLP = 64
NUM_LAYERS = 2
IMG = 16
PATCH = 8
CHANNELS = 3
GRID_P = IMG // PATCH
NUM_PATCHES = GRID_P * GRID_P            # 4
SEQ = NUM_PATCHES + 1                    # +1 CLS token = 5
PATCH_DIM = CHANNELS * PATCH * PATCH     # 192
EPS = 1e-12                              # HF ViT layer_norm_eps
ATTN_SCALE = 1.0 / (HEAD_DIM ** 0.5)
SQRT2 = 2.0 ** 0.5

VEC_W = 128                              # lane width of the packed vector slab
ROWS_PER_LAYER = 8                       # vec-slab rows per encoder layer (8-aligned)
VEC_ROWS = NUM_LAYERS * ROWS_PER_LAYER + 3
HEAD_PAD = 128                           # classifier output padded to a full lane tile


# ----------------------------------- Pallas kernel -------------------------------------
def _layernorm(v, g, b):
    mu = jnp.mean(v, axis=-1, keepdims=True)
    var = jnp.mean((v - mu) ** 2, axis=-1, keepdims=True)
    return (v - mu) * jax.lax.rsqrt(var + EPS) * g + b


def vit_kernel(patches_ref, pw_ref, base_ref, vec_ref, wqkv_ref, bqkv_ref,
               wo_ref, w1_ref, w2_ref, hw_ref, logits_ref, attn_ref):
    """One example per grid step; all weights VMEM-resident (constant index maps)."""
    f32, bf16 = jnp.float32, jnp.bfloat16

    def vrow(r, w):                       # (1, w) slice of the packed vector slab
        return vec_ref[r:r + 1, :w]

    # ---- patch embedding: CLS pixel row is zeros; cls/pos/patch-bias are pre-folded into base
    x = jnp.dot(patches_ref[...].astype(bf16), pw_ref[...].astype(bf16),
                preferred_element_type=f32) + base_ref[...]            # (SEQ, HIDDEN)

    for l in range(NUM_LAYERS):
        r0 = l * ROWS_PER_LAYER
        ln1_g, ln1_b = vrow(r0 + 0, HIDDEN), vrow(r0 + 1, HIDDEN)
        bo = vrow(r0 + 2, HIDDEN)
        ln2_g, ln2_b = vrow(r0 + 3, HIDDEN), vrow(r0 + 4, HIDDEN)
        b1 = vrow(r0 + 5, MLP)
        b2 = vrow(r0 + 6, HIDDEN)

        # --- self attention (pre-LayerNorm), head-batched; no activation head slicing ---
        h = _layernorm(x, ln1_g, ln1_b)                                 # (SEQ, HIDDEN) f32
        hb = jnp.broadcast_to(h.astype(bf16)[None],
                              (3 * NUM_HEADS, SEQ, HIDDEN))             # (3NH, SEQ, HIDDEN)
        qkv = jnp.einsum('gsd,gde->gse', hb, wqkv_ref[l].astype(bf16),
                         preferred_element_type=f32) + bqkv_ref[l]      # (3NH, SEQ, HD)
        q = qkv[:NUM_HEADS]
        k = qkv[NUM_HEADS:2 * NUM_HEADS]
        v = qkv[2 * NUM_HEADS:]

        scores = jnp.einsum('hqe,hke->hqk', q.astype(bf16), k.astype(bf16),
                            preferred_element_type=f32) * ATTN_SCALE    # (NH, SEQ, SEQ)
        scores = scores - jnp.max(scores, axis=-1, keepdims=True)
        e = jnp.exp(scores)
        probs = e / jnp.sum(e, axis=-1, keepdims=True)                  # exact softmax (f32)
        attn_ref[l] = probs                                             # per-example diag block

        ctx = jnp.einsum('hqk,hke->hqe', probs.astype(bf16), v.astype(bf16),
                         preferred_element_type=f32)                    # (NH, SEQ, HD)
        proj = jnp.einsum('hse,heo->hso', ctx.astype(bf16), wo_ref[l].astype(bf16),
                          preferred_element_type=f32)                   # (NH, SEQ, HIDDEN)
        x = x + jnp.sum(proj, axis=0) + bo                              # residual 1

        # --- MLP (pre-LayerNorm), exact GELU (HF "gelu") ---
        h2 = _layernorm(x, ln2_g, ln2_b)
        m = jnp.dot(h2.astype(bf16), w1_ref[l].astype(bf16),
                    preferred_element_type=f32) + b1
        m = 0.5 * m * (1.0 + jax.lax.erf(m / SQRT2))
        x = x + jnp.dot(m.astype(bf16), w2_ref[l].astype(bf16),
                        preferred_element_type=f32) + b2                # residual 2

    # ---- final LayerNorm + classifier on the CLS row only; lane-dense (1,128) store ----
    rF = NUM_LAYERS * ROWS_PER_LAYER
    cls = _layernorm(x[0:1, :], vrow(rF + 0, HIDDEN), vrow(rF + 1, HIDDEN))
    head_b = vec_ref[rF + 2:rF + 3, :]                                  # (1, 128), zero-padded
    logits_ref[...] = jnp.dot(cls.astype(bf16), hw_ref[...].astype(bf16),
                              preferred_element_type=f32) + head_b


# ----------------------------------- parameters ---------------------------------------
def init_params(key):
    keys = iter(jax.random.split(key, 8 + NUM_LAYERS * 8))

    def nrm(shape, scale=0.02):
        return (scale * jax.random.normal(next(keys), shape)).astype(jnp.float32)

    zeros = lambda *s: jnp.zeros(s, jnp.float32)
    ones = lambda *s: jnp.ones(s, jnp.float32)

    params = {
        "patch_w": nrm((PATCH_DIM, HIDDEN)),
        "patch_b": zeros(1, HIDDEN),
        "cls": nrm((1, 1, HIDDEN)),
        "pos": nrm((1, SEQ, HIDDEN)),
        "ln_g": ones(1, HIDDEN),
        "ln_b": zeros(1, HIDDEN),
        "head_w": nrm((HIDDEN, NUM_CLASSES)),
        "head_b": zeros(1, NUM_CLASSES),
        "layers": [],
    }
    for _ in range(NUM_LAYERS):
        params["layers"].append({
            "ln1_g": ones(1, HIDDEN), "ln1_b": zeros(1, HIDDEN),
            "wq": nrm((HIDDEN, HIDDEN)), "bq": zeros(1, HIDDEN),
            "wk": nrm((HIDDEN, HIDDEN)), "bk": zeros(1, HIDDEN),
            "wv": nrm((HIDDEN, HIDDEN)), "bv": zeros(1, HIDDEN),
            "wo": nrm((HIDDEN, HIDDEN)), "bo": zeros(1, HIDDEN),
            "ln2_g": ones(1, HIDDEN), "ln2_b": zeros(1, HIDDEN),
            "w1": nrm((HIDDEN, MLP)), "b1": zeros(1, MLP),
            "w2": nrm((MLP, HIDDEN)), "b2": zeros(1, HIDDEN),
        })
    return params


def _row(v, width=VEC_W):
    v = jnp.asarray(v, jnp.float32).reshape(1, -1)
    return jnp.pad(v, ((0, 0), (0, width - v.shape[1])))


def pack_params(params):
    """Pack per-tensor weights into a handful of lane-dense slabs (done once, outside the kernel)."""
    vec_rows, wqkv_l, bqkv_l, wo_l, w1_l, w2_l = [], [], [], [], [], []

    def per_head(w):                                   # (HIDDEN, HIDDEN) -> (NH, HIDDEN, HD)
        return w.reshape(HIDDEN, NUM_HEADS, HEAD_DIM).transpose(1, 0, 2)

    for lp in params["layers"]:
        vec_rows += [_row(lp["ln1_g"]), _row(lp["ln1_b"]), _row(lp["bo"]),
                     _row(lp["ln2_g"]), _row(lp["ln2_b"]), _row(lp["b1"]),
                     _row(lp["b2"]), jnp.zeros((1, VEC_W), jnp.float32)]
        wqkv_l.append(jnp.concatenate([per_head(lp["wq"]), per_head(lp["wk"]),
                                       per_head(lp["wv"])], axis=0))        # (3NH, H, HD)
        bqkv_l.append(jnp.concatenate(
            [lp["bq"].reshape(NUM_HEADS, 1, HEAD_DIM),
             lp["bk"].reshape(NUM_HEADS, 1, HEAD_DIM),
             lp["bv"].reshape(NUM_HEADS, 1, HEAD_DIM)], axis=0))             # (3NH, 1, HD)
        wo_l.append(lp["wo"].reshape(NUM_HEADS, HEAD_DIM, HIDDEN))           # (NH, HD, H)
        w1_l.append(lp["w1"])
        w2_l.append(lp["w2"])
    vec_rows += [_row(params["ln_g"]), _row(params["ln_b"]), _row(params["head_b"])]

    # base[0]   = cls + pos[0];  base[1+i] = patch_b + pos[1+i]  (same for every example)
    base = jnp.concatenate(
        [params["cls"].reshape(1, HIDDEN) + params["pos"][0, 0:1, :],
         params["patch_b"] + params["pos"][0, 1:, :]], axis=0)               # (SEQ, HIDDEN)

    return {
        "vec": jnp.concatenate(vec_rows, axis=0),                            # (VEC_ROWS, 128)
        "wqkv": jnp.stack(wqkv_l),                                           # (L, 3NH, H, HD)
        "bqkv": jnp.stack(bqkv_l),                                           # (L, 3NH, 1, HD)
        "wo": jnp.stack(wo_l),                                               # (L, NH, HD, H)
        "w1": jnp.stack(w1_l),                                               # (L, H, MLP)
        "w2": jnp.stack(w2_l),                                               # (L, MLP, H)
        "patch_w": params["patch_w"],                                        # (PATCH_DIM, H)
        "head_w": jnp.pad(params["head_w"],
                          ((0, 0), (0, HEAD_PAD - NUM_CLASSES))),            # (H, 128)
        "base": base,
    }


# ----------------------------------- forward ------------------------------------------
def vit_classifier_forward(x, packed):
    """x: NCHW (B, 3, IMG, IMG) float32 in [0, 1]. Returns (logits, attentions tuple)."""
    B = x.shape[0]

    # processor: do_rescale=False, image_mean=image_std=0.5
    xn = (x - 0.5) / 0.5
    # non-overlapping patches flattened channel-major (matches Conv2d patch embedding)
    p = xn.reshape(B, CHANNELS, GRID_P, PATCH, GRID_P, PATCH)
    p = p.transpose(0, 2, 4, 1, 3, 5).reshape(B, NUM_PATCHES, PATCH_DIM)
    # CLS row gets zero pixels so the patch matmul covers all SEQ rows in one dot
    patches = jnp.concatenate([jnp.zeros((B, 1, PATCH_DIM), jnp.float32), p], axis=1)

    const = lambda nd: (lambda b: (0,) * nd)
    in_specs = [
        pl.BlockSpec((None, SEQ, PATCH_DIM), lambda b: (b, 0, 0)),           # patches (per b)
        pl.BlockSpec((PATCH_DIM, HIDDEN), const(2)),                         # patch_w
        pl.BlockSpec((SEQ, HIDDEN), const(2)),                               # base
        pl.BlockSpec((VEC_ROWS, VEC_W), const(2)),                           # vector slab
        pl.BlockSpec((NUM_LAYERS, 3 * NUM_HEADS, HIDDEN, HEAD_DIM), const(4)),
        pl.BlockSpec((NUM_LAYERS, 3 * NUM_HEADS, 1, HEAD_DIM), const(4)),
        pl.BlockSpec((NUM_LAYERS, NUM_HEADS, HEAD_DIM, HIDDEN), const(4)),
        pl.BlockSpec((NUM_LAYERS, HIDDEN, MLP), const(3)),
        pl.BlockSpec((NUM_LAYERS, MLP, HIDDEN), const(3)),
        pl.BlockSpec((HIDDEN, HEAD_PAD), const(2)),
    ]
    out_specs = [
        pl.BlockSpec((None, 1, HEAD_PAD), lambda b: (b, 0, 0)),
        pl.BlockSpec((None, NUM_LAYERS, NUM_HEADS, SEQ, SEQ),
                     lambda b: (b, 0, 0, 0, 0)),
    ]
    out_shape = (
        jax.ShapeDtypeStruct((B, 1, HEAD_PAD), jnp.float32),
        jax.ShapeDtypeStruct((B, NUM_LAYERS, NUM_HEADS, SEQ, SEQ), jnp.float32),
    )
    inputs = [patches, packed["patch_w"], packed["base"], packed["vec"],
              packed["wqkv"], packed["bqkv"], packed["wo"], packed["w1"],
              packed["w2"], packed["head_w"]]

    # advisory cost estimate for the XLA scheduler
    flops_layer = (2 * SEQ * HIDDEN * 3 * HIDDEN
                   + 4 * NUM_HEADS * SEQ * SEQ * HEAD_DIM
                   + 2 * NUM_HEADS * SEQ * HEAD_DIM * HIDDEN
                   + 4 * SEQ * HIDDEN * MLP)
    flops = B * (2 * SEQ * PATCH_DIM * HIDDEN + NUM_LAYERS * flops_layer
                 + 2 * HIDDEN * HEAD_PAD)
    transcendentals = B * NUM_LAYERS * (NUM_HEADS * SEQ * SEQ + SEQ * MLP)
    bytes_accessed = 4 * (sum(int(a.size) for a in inputs)
                          + B * HEAD_PAD + B * NUM_LAYERS * NUM_HEADS * SEQ * SEQ)

    outs = pl.pallas_call(
        vit_kernel,
        out_shape=out_shape,
        grid_spec=pltpu.PrefetchScalarGridSpec(
            num_scalar_prefetch=0, grid=(B,),
            in_specs=in_specs, out_specs=out_specs),
        compiler_params=pltpu.CompilerParams(
            dimension_semantics=("parallel",),            # v7x: one example per TensorCore
            vmem_limit_bytes=16 * 1024 * 1024),
        cost_estimate=pl.CostEstimate(flops=flops, transcendentals=transcendentals,
                                      bytes_accessed=bytes_accessed),
    )(*inputs)

    logits = outs[0][:, 0, :NUM_CLASSES]                                      # (B, NUM_CLASSES)
    attn_all = outs[1]                                                        # (B, L, NH, SEQ, SEQ)
    attentions = tuple(attn_all[:, l] for l in range(NUM_LAYERS))
    return logits, attentions


# ------------------------------------- main --------------------------------------------
if __name__ == "__main__":
    key = jax.random.PRNGKey(0)
    k_param, k_x = jax.random.split(key)
    params = init_params(k_param)
    packed = pack_params(params)

    x = jax.random.uniform(k_x, (2, CHANNELS, IMG, IMG), dtype=jnp.float32)   # [2, 3, 16, 16]

    fwd = jax.jit(vit_classifier_forward)
    logits, attentions = fwd(x, packed)
    jax.block_until_ready((logits, attentions))

    assert logits.shape == (2, NUM_CLASSES)
    assert len(attentions) == NUM_LAYERS
    assert attentions[0].shape == (2, NUM_HEADS, SEQ, SEQ)
    assert bool(jnp.all(jnp.isfinite(logits)))
    for a in attentions:
        assert bool(jnp.all(jnp.isfinite(a)))
        assert bool(jnp.allclose(jnp.sum(a, axis=-1), 1.0, atol=1e-3))        # exact-divide softmax

    print("KERNEL_OK")
</pallas_src>

<mosaic_0001>
module attributes {stable_mosaic.version = 11 : i64} {
  func.func @vit_kernel(%arg0: i32, %arg1: memref<1x5x192xf32, #tpu.memory_space<vmem>>, %arg2: memref<192x32xf32, #tpu.memory_space<vmem>>, %arg3: memref<5x32xf32, #tpu.memory_space<vmem>>, %arg4: memref<19x128xf32, #tpu.memory_space<vmem>>, %arg5: memref<2x12x32x8xf32, #tpu.memory_space<vmem>>, %arg6: memref<2x12x1x8xf32, #tpu.memory_space<vmem>>, %arg7: memref<2x4x8x32xf32, #tpu.memory_space<vmem>>, %arg8: memref<2x32x64xf32, #tpu.memory_space<vmem>>, %arg9: memref<2x64x32xf32, #tpu.memory_space<vmem>>, %arg10: memref<32x128xf32, #tpu.memory_space<vmem>>, %arg11: memref<1x1x128xf32, #tpu.memory_space<vmem>>, %arg12: memref<1x2x4x5x5xf32, #tpu.memory_space<vmem>>) attributes {dimension_semantics = [#tpu.dimension_semantics<parallel>], iteration_bounds = array<i64: 2>, scalar_prefetch = 0 : i64, scratch_operands = 0 : i64, tpu.core_type = #tpu.core_type<tc>, window_params = [{transform_indices = @transform_0, window_bounds = array<i64: 1, 5, 192>}, {pipeline_mode = #tpu.pipeline_mode<synchronous>, transform_indices = @transform_1, window_bounds = array<i64: 192, 32>}, {pipeline_mode = #tpu.pipeline_mode<synchronous>, transform_indices = @transform_2, window_bounds = array<i64: 5, 32>}, {pipeline_mode = #tpu.pipeline_mode<synchronous>, transform_indices = @transform_3, window_bounds = array<i64: 19, 128>}, {pipeline_mode = #tpu.pipeline_mode<synchronous>, transform_indices = @transform_4, window_bounds = array<i64: 2, 12, 32, 8>}, {pipeline_mode = #tpu.pipeline_mode<synchronous>, transform_indices = @transform_5, window_bounds = array<i64: 2, 12, 1, 8>}, {pipeline_mode = #tpu.pipeline_mode<synchronous>, transform_indices = @transform_6, window_bounds = array<i64: 2, 4, 8, 32>}, {pipeline_mode = #tpu.pipeline_mode<synchronous>, transform_indices = @transform_7, window_bounds = array<i64: 2, 32, 64>}, {pipeline_mode = #tpu.pipeline_mode<synchronous>, transform_indices = @transform_8, window_bounds = array<i64: 2, 64, 32>}, {pipeline_mode = #tpu.pipeline_mode<synchronous>, transform_indices = @transform_9, window_bounds = array<i64: 32, 128>}, {transform_indices = @transform_10, window_bounds = array<i64: 1, 1, 128>}, {transform_indices = @transform_11, window_bounds = array<i64: 1, 2, 4, 5, 5>}]} {
    %c0 = arith.constant 0 : index
    %c0_0 = arith.constant 0 : index
    %c0_1 = arith.constant 0 : index
    %0 = vector.load %arg1[%c0, %c0_0, %c0_1] : memref<1x5x192xf32, #tpu.memory_space<vmem>>, vector<1x5x192xf32>
    %1 = vector.shape_cast %0 : vector<1x5x192xf32> to vector<5x192xf32>
    %2 = arith.truncf %1 : vector<5x192xf32> to vector<5x192xbf16>
    %c0_2 = arith.constant 0 : index
    %c0_3 = arith.constant 0 : index
    %3 = vector.load %arg2[%c0_2, %c0_3] : memref<192x32xf32, #tpu.memory_space<vmem>>, vector<192x32xf32>
    %4 = arith.truncf %3 : vector<192x32xf32> to vector<192x32xbf16>
    %cst = arith.constant dense<0.000000e+00> : vector<5x32xf32>
    %5 = tpu.matmul %2, %4, %cst {dimension_numbers = #tpu.dot_dimension_numbers<[1], [0], [0], [1], [0, 0, 1, 1], [], []>} : vector<5x192xbf16>, vector<192x32xbf16>, vector<5x32xf32> -> vector<5x32xf32>
    %c0_4 = arith.constant 0 : index
    %c0_5 = arith.constant 0 : index
    %6 = vector.load %arg3[%c0_4, %c0_5] : memref<5x32xf32, #tpu.memory_space<vmem>>, vector<5x32xf32>
    %7 = arith.addf %5, %6 : vector<5x32xf32>
    %c0_6 = arith.constant 0 : index
    %c0_7 = arith.constant 0 : index
    %8 = vector.load %arg4[%c0_6, %c0_7] : memref<19x128xf32, #tpu.memory_space<vmem>>, vector<1x32xf32>
    %c1 = arith.constant 1 : index
    %c0_8 = arith.constant 0 : index
    %9 = vector.load %arg4[%c1, %c0_8] : memref<19x128xf32, #tpu.memory_space<vmem>>, vector<1x32xf32>
    %c2 = arith.constant 2 : index
    %c0_9 = arith.constant 0 : index
    %10 = vector.load %arg4[%c2, %c0_9] : memref<19x128xf32, #tpu.memory_space<vmem>>, vector<1x32xf32>
    %c3 = arith.constant 3 : index
    %c0_10 = arith.constant 0 : index
    %11 = vector.load %arg4[%c3, %c0_10] : memref<19x128xf32, #tpu.memory_space<vmem>>, vector<1x32xf32>
    %c4 = arith.constant 4 : index
    %c0_11 = arith.constant 0 : index
    %12 = vector.load %arg4[%c4, %c0_11] : memref<19x128xf32, #tpu.memory_space<vmem>>, vector<1x32xf32>
    %c5 = arith.constant 5 : index
    %c0_12 = arith.constant 0 : index
    %13 = vector.load %arg4[%c5, %c0_12] : memref<19x128xf32, #tpu.memory_space<vmem>>, vector<1x64xf32>
    %c6 = arith.constant 6 : index
    %c0_13 = arith.constant 0 : index
    %14 = vector.load %arg4[%c6, %c0_13] : memref<19x128xf32, #tpu.memory_space<vmem>>, vector<1x32xf32>
    %cst_14 = arith.constant dense<0.000000e+00> : vector<5xf32>
    %15 = vector.multi_reduction <add>, %7, %cst_14 [1] : vector<5x32xf32> to vector<5xf32>
    %16 = vector.shape_cast %15 : vector<5xf32> to vector<5x1xf32>
    %cst_15 = arith.constant 3.200000e+01 : f32
    %17 = vector.broadcast %cst_15 : f32 to vector<5x1xf32>
    %18 = arith.divf %16, %17 : vector<5x1xf32>
    %19 = vector.broadcast %18 : vector<5x1xf32> to vector<5x32xf32>
    %20 = arith.subf %7, %19 : vector<5x32xf32>
    %21 = arith.mulf %20, %20 : vector<5x32xf32>
    %cst_16 = arith.constant dense<0.000000e+00> : vector<5xf32>
    %22 = vector.multi_reduction <add>, %21, %cst_16 [1] : vector<5x32xf32> to vector<5xf32>
    %23 = vector.shape_cast %22 : vector<5xf32> to vector<5x1xf32>
    %cst_17 = arith.constant 3.200000e+01 : f32
    %24 = vector.broadcast %cst_17 : f32 to vector<5x1xf32>
    %25 = arith.divf %23, %24 : vector<5x1xf32>
    %26 = vector.broadcast %18 : vector<5x1xf32> to vector<5x32xf32>
    %27 = arith.subf %7, %26 : vector<5x32xf32>
    %cst_18 = arith.constant 9.99999996E-13 : f32
    %28 = vector.broadcast %cst_18 : f32 to vector<5x1xf32>
    %29 = arith.addf %25, %28 : vector<5x1xf32>
    %30 = math.rsqrt %29 : vector<5x1xf32>
    %31 = vector.broadcast %30 : vector<5x1xf32> to vector<5x32xf32>
    %32 = arith.mulf %27, %31 : vector<5x32xf32>
    %33 = vector.broadcast %8 : vector<1x32xf32> to vector<5x32xf32>
    %34 = arith.mulf %32, %33 : vector<5x32xf32>
    %35 = vector.broadcast %9 : vector<1x32xf32> to vector<5x32xf32>
    %36 = arith.addf %34, %35 : vector<5x32xf32>
    %37 = arith.truncf %36 : vector<5x32xf32> to vector<5x32xbf16>
    %38 = vector.shape_cast %37 : vector<5x32xbf16> to vector<1x5x32xbf16>
    %39 = vector.shape_cast %38 : vector<1x5x32xbf16> to vector<1x5x32xbf16>
    %40 = vector.broadcast %39 : vector<1x5x32xbf16> to vector<12x5x32xbf16>
    %c0_19 = arith.constant 0 : index
    %c0_20 = arith.constant 0 : index
    %c0_21 = arith.constant 0 : index
    %c0_22 = arith.constant 0 : index
    %41 = vector.load %arg5[%c0_19, %c0_20, %c0_21, %c0_22] : memref<2x12x32x8xf32, #tpu.memory_space<vmem>>, vector<1x12x32x8xf32>
    %42 = vector.shape_cast %41 : vector<1x12x32x8xf32> to vector<12x32x8xf32>
    %43 = arith.truncf %42 : vector<12x32x8xf32> to vector<12x32x8xbf16>
    "tpu.trace_start"() <{level = 10 : i32, message = "gsd,gde->gse"}> : () -> ()
    %cst_23 = arith.constant dense<0.000000e+00> : vector<12x5x8xf32>
    %44 = tpu.matmul %40, %43, %cst_23 {dimension_numbers = #tpu.dot_dimension_numbers<[2], [1], [1], [2], [0, 0, 0, 1, 1, 2], [0], [0]>} : vector<12x5x32xbf16>, vector<12x32x8xbf16>, vector<12x5x8xf32> -> vector<12x5x8xf32>
    "tpu.trace_stop"() : () -> ()
    %c0_24 = arith.constant 0 : index
    %c0_25 = arith.constant 0 : index
    %c0_26 = arith.constant 0 : index
    %c0_27 = arith.constant 0 : index
    %45 = vector.load %arg6[%c0_24, %c0_25, %c0_26, %c0_27] : memref<2x12x1x8xf32, #tpu.memory_space<vmem>>, vector<1x12x1x8xf32>
    %46 = vector.shape_cast %45 : vector<1x12x1x8xf32> to vector<12x1x8xf32>
    %47 = vector.broadcast %46 : vector<12x1x8xf32> to vector<12x5x8xf32>
    %48 = arith.addf %44, %47 : vector<12x5x8xf32>
    %49 = vector.extract_strided_slice %48 {offsets = [0, 0, 0], sizes = [4, 5, 8], strides = [1, 1, 1]} : vector<12x5x8xf32> to vector<4x5x8xf32>
    %50 = vector.extract_strided_slice %48 {offsets = [4, 0, 0], sizes = [4, 5, 8], strides = [1, 1, 1]} : vector<12x5x8xf32> to vector<4x5x8xf32>
    %51 = vector.extract_strided_slice %48 {offsets = [8, 0, 0], sizes = [4, 5, 8], strides = [1, 1, 1]} : vector<12x5x8xf32> to vector<4x5x8xf32>
    %52 = arith.truncf %49 : vector<4x5x8xf32> to vector<4x5x8xbf16>
    %53 = arith.truncf %50 : vector<4x5x8xf32> to vector<4x5x8xbf16>
    "tpu.trace_start"() <{level = 10 : i32, message = "hqe,hke->hqk"}> : () -> ()
    %cst_28 = arith.constant dense<0.000000e+00> : vector<4x5x5xf32>
    %54 = tpu.matmul %52, %53, %cst_28 {dimension_numbers = #tpu.dot_dimension_numbers<[2], [2], [1], [1], [0, 0, 0, 1, 1, 1], [0], [0]>} : vector<4x5x8xbf16>, vector<4x5x8xbf16>, vector<4x5x5xf32> -> vector<4x5x5xf32>
    "tpu.trace_stop"() : () -> ()
    %cst_29 = arith.constant 0.353553385 : f32
    %55 = vector.broadcast %cst_29 : f32 to vector<4x5x5xf32>
    %56 = arith.mulf %54, %55 : vector<4x5x5xf32>
    %cst_30 = arith.constant dense<0xFF800000> : vector<4x5xf32>
    %57 = vector.multi_reduction <maximumf>, %56, %cst_30 [2] : vector<4x5x5xf32> to vector<4x5xf32>
    %58 = vector.shape_cast %57 : vector<4x5xf32> to vector<4x5x1xf32>
    %59 = vector.broadcast %58 : vector<4x5x1xf32> to vector<4x5x5xf32>
    %60 = arith.subf %56, %59 : vector<4x5x5xf32>
    %61 = math.exp %60 : vector<4x5x5xf32>
    %cst_31 = arith.constant dense<0.000000e+00> : vector<4x5xf32>
    %62 = vector.multi_reduction <add>, %61, %cst_31 [2] : vector<4x5x5xf32> to vector<4x5xf32>
    %63 = vector.shape_cast %62 : vector<4x5xf32> to vector<4x5x1xf32>
    %64 = vector.broadcast %63 : vector<4x5x1xf32> to vector<4x5x5xf32>
    %65 = arith.divf %61, %64 : vector<4x5x5xf32>
    %c0_32 = arith.constant 0 : index
    %c0_33 = arith.constant 0 : index
    %c0_34 = arith.constant 0 : index
    %c0_35 = arith.constant 0 : index
    %c0_36 = arith.constant 0 : index
    %66 = vector.load %arg12[%c0_32, %c0_33, %c0_34, %c0_35, %c0_36] : memref<1x2x4x5x5xf32, #tpu.memory_space<vmem>>, vector<1x1x4x5x5xf32>
    %67 = vector.shape_cast %66 : vector<1x1x4x5x5xf32> to vector<4x5x5xf32>
    %68 = vector.shape_cast %65 : vector<4x5x5xf32> to vector<1x1x4x5x5xf32>
    tpu.vector_store %arg12[%c0_32, %c0_33, %c0_34, %c0_35, %c0_36], %68 {strides = array<i32>} : memref<1x2x4x5x5xf32, #tpu.memory_space<vmem>>, vector<1x1x4x5x5xf32>,
    %69 = arith.truncf %65 : vector<4x5x5xf32> to vector<4x5x5xbf16>
    %70 = arith.truncf %51 : vector<4x5x8xf32> to vector<4x5x8xbf16>
    "tpu.trace_start"() <{level = 10 : i32, message = "hqk,hke->hqe"}> : () -> ()
    %cst_37 = arith.constant dense<0.000000e+00> : vector<4x5x8xf32>
    %71 = tpu.matmul %69, %70, %cst_37 {dimension_numbers = #tpu.dot_dimension_numbers<[2], [1], [1], [2], [0, 0, 0, 1, 1, 2], [0], [0]>} : vector<4x5x5xbf16>, vector<4x5x8xbf16>, vector<4x5x8xf32> -> vector<4x5x8xf32>
    "tpu.trace_stop"() : () -> ()
    %72 = arith.truncf %71 : vector<4x5x8xf32> to vector<4x5x8xbf16>
    %c0_38 = arith.constant 0 : index
    %c0_39 = arith.constant 0 : index
    %c0_40 = arith.constant 0 : index
    %c0_41 = arith.constant 0 : index
    %73 = vector.load %arg7[%c0_38, %c0_39, %c0_40, %c0_41] : memref<2x4x8x32xf32, #tpu.memory_space<vmem>>, vector<1x4x8x32xf32>
    %74 = vector.shape_cast %73 : vector<1x4x8x32xf32> to vector<4x8x32xf32>
    %75 = arith.truncf %74 : vector<4x8x32xf32> to vector<4x8x32xbf16>
    "tpu.trace_start"() <{level = 10 : i32, message = "hse,heo->hso"}> : () -> ()
    %cst_42 = arith.constant dense<0.000000e+00> : vector<4x5x32xf32>
    %76 = tpu.matmul %72, %75, %cst_42 {dimension_numbers = #tpu.dot_dimension_numbers<[2], [1], [1], [2], [0, 0, 0, 1, 1, 2], [0], [0]>} : vector<4x5x8xbf16>, vector<4x8x32xbf16>, vector<4x5x32xf32> -> vector<4x5x32xf32>
    "tpu.trace_stop"() : () -> ()
    %cst_43 = arith.constant dense<0.000000e+00> : vector<5x32xf32>
    %77 = vector.multi_reduction <add>, %76, %cst_43 [0] : vector<4x5x32xf32> to vector<5x32xf32>
    %78 = arith.addf %7, %77 : vector<5x32xf32>
    %79 = vector.broadcast %10 : vector<1x32xf32> to vector<5x32xf32>
    %80 = arith.addf %78, %79 : vector<5x32xf32>
    %cst_44 = arith.constant dense<0.000000e+00> : vector<5xf32>
    %81 = vector.multi_reduction <add>, %80, %cst_44 [1] : vector<5x32xf32> to vector<5xf32>
    %82 = vector.shape_cast %81 : vector<5xf32> to vector<5x1xf32>
    %cst_45 = arith.constant 3.200000e+01 : f32
    %83 = vector.broadcast %cst_45 : f32 to vector<5x1xf32>
    %84 = arith.divf %82, %83 : vector<5x1xf32>
    %85 = vector.broadcast %84 : vector<5x1xf32> to vector<5x32xf32>
    %86 = arith.subf %80, %85 : vector<5x32xf32>
    %87 = arith.mulf %86, %86 : vector<5x32xf32>
    %cst_46 = arith.constant dense<0.000000e+00> : vector<5xf32>
    %88 = vector.multi_reduction <add>, %87, %cst_46 [1] : vector<5x32xf32> to vector<5xf32>
    %89 = vector.shape_cast %88 : vector<5xf32> to vector<5x1xf32>
    %cst_47 = arith.constant 3.200000e+01 : f32
    %90 = vector.broadcast %cst_47 : f32 to vector<5x1xf32>
    %91 = arith.divf %89, %90 : vector<5x1xf32>
    %92 = vector.broadcast %84 : vector<5x1xf32> to vector<5x32xf32>
    %93 = arith.subf %80, %92 : vector<5x32xf32>
    %cst_48 = arith.constant 9.99999996E-13 : f32
    %94 = vector.broadcast %cst_48 : f32 to vector<5x1xf32>
    %95 = arith.addf %91, %94 : vector<5x1xf32>
    %96 = math.rsqrt %95 : vector<5x1xf32>
    %97 = vector.broadcast %96 : vector<5x1xf32> to vector<5x32xf32>
    %98 = arith.mulf %93, %97 : vector<5x32xf32>
    %99 = vector.broadcast %11 : vector<1x32xf32> to vector<5x32xf32>
    %100 = arith.mulf %98, %99 : vector<5x32xf32>
    %101 = vector.broadcast %12 : vector<1x32xf32> to vector<5x32xf32>
    %102 = arith.addf %100, %101 : vector<5x32xf32>
    %103 = arith.truncf %102 : vector<5x32xf32> to vector<5x32xbf16>
    %c0_49 = arith.constant 0 : index
    %c0_50 = arith.constant 0 : index
    %c0_51 = arith.constant 0 : index
    %104 = vector.load %arg8[%c0_49, %c0_50, %c0_51] : memref<2x32x64xf32, #tpu.memory_space<vmem>>, vector<1x32x64xf32>
    %105 = vector.shape_cast %104 : vector<1x32x64xf32> to vector<32x64xf32>
    %106 = arith.truncf %105 : vector<32x64xf32> to vector<32x64xbf16>
    %cst_52 = arith.constant dense<0.000000e+00> : vector<5x64xf32>
    %107 = tpu.matmul %103, %106, %cst_52 {dimension_numbers = #tpu.dot_dimension_numbers<[1], [0], [0], [1], [0, 0, 1, 1], [], []>} : vector<5x32xbf16>, vector<32x64xbf16>, vector<5x64xf32> -> vector<5x64xf32>
    %108 = vector.broadcast %13 : vector<1x64xf32> to vector<5x64xf32>
    %109 = arith.addf %107, %108 : vector<5x64xf32>
    %cst_53 = arith.constant 5.000000e-01 : f32
    %110 = vector.broadcast %cst_53 : f32 to vector<5x64xf32>
    %111 = arith.mulf %110, %109 : vector<5x64xf32>
    %cst_54 = arith.constant 1.41421354 : f32
    %112 = vector.broadcast %cst_54 : f32 to vector<5x64xf32>
    %113 = arith.divf %109, %112 : vector<5x64xf32>
    %114 = math.erf %113 : vector<5x64xf32>
    %cst_55 = arith.constant 1.000000e+00 : f32
    %115 = vector.broadcast %cst_55 : f32 to vector<5x64xf32>
    %116 = arith.addf %115, %114 : vector<5x64xf32>
    %117 = arith.mulf %111, %116 : vector<5x64xf32>
    %118 = arith.truncf %117 : vector<5x64xf32> to vector<5x64xbf16>
    %c0_56 = arith.constant 0 : index
    %c0_57 = arith.constant 0 : index
    %c0_58 = arith.constant 0 : index
    %119 = vector.load %arg9[%c0_56, %c0_57, %c0_58] : memref<2x64x32xf32, #tpu.memory_space<vmem>>, vector<1x64x32xf32>
    %120 = vector.shape_cast %119 : vector<1x64x32xf32> to vector<64x32xf32>
    %121 = arith.truncf %120 : vector<64x32xf32> to vector<64x32xbf16>
    %cst_59 = arith.constant dense<0.000000e+00> : vector<5x32xf32>
    %122 = tpu.matmul %118, %121, %cst_59 {dimension_numbers = #tpu.dot_dimension_numbers<[1], [0], [0], [1], [0, 0, 1, 1], [], []>} : vector<5x64xbf16>, vector<64x32xbf16>, vector<5x32xf32> -> vector<5x32xf32>
    %123 = arith.addf %80, %122 : vector<5x32xf32>
    %124 = vector.broadcast %14 : vector<1x32xf32> to vector<5x32xf32>
    %125 = arith.addf %123, %124 : vector<5x32xf32>
    %c8 = arith.constant 8 : index
    %c0_60 = arith.constant 0 : index
    %126 = vector.load %arg4[%c8, %c0_60] : memref<19x128xf32, #tpu.memory_space<vmem>>, vector<1x32xf32>
    %c9 = arith.constant 9 : index
    %c0_61 = arith.constant 0 : index
    %127 = vector.load %arg4[%c9, %c0_61] : memref<19x128xf32, #tpu.memory_space<vmem>>, vector<1x32xf32>
    %c10 = arith.constant 10 : index
    %c0_62 = arith.constant 0 : index
    %128 = vector.load %arg4[%c10, %c0_62] : memref<19x128xf32, #tpu.memory_space<vmem>>, vector<1x32xf32>
    %c11 = arith.constant 11 : index
    %c0_63 = arith.constant 0 : index
    %129 = vector.load %arg4[%c11, %c0_63] : memref<19x128xf32, #tpu.memory_space<vmem>>, vector<1x32xf32>
    %c12 = arith.constant 12 : index
    %c0_64 = arith.constant 0 : index
    %130 = vector.load %arg4[%c12, %c0_64] : memref<19x128xf32, #tpu.memory_space<vmem>>, vector<1x32xf32>
    %c13 = arith.constant 13 : index
    %c0_65 = arith.constant 0 : index
    %131 = vector.load %arg4[%c13, %c0_65] : memref<19x128xf32, #tpu.memory_space<vmem>>, vector<1x64xf32>
    %c14 = arith.constant 14 : index
    %c0_66 = arith.constant 0 : index
    %132 = vector.load %arg4[%c14, %c0_66] : memref<19x128xf32, #tpu.memory_space<vmem>>, vector<1x32xf32>
    %cst_67 = arith.constant dense<0.000000e+00> : vector<5xf32>
    %133 = vector.multi_reduction <add>, %125, %cst_67 [1] : vector<5x32xf32> to vector<5xf32>
    %134 = vector.shape_cast %133 : vector<5xf32> to vector<5x1xf32>
    %cst_68 = arith.constant 3.200000e+01 : f32
    %135 = vector.broadcast %cst_68 : f32 to vector<5x1xf32>
    %136 = arith.divf %134, %135 : vector<5x1xf32>
    %137 = vector.broadcast %136 : vector<5x1xf32> to vector<5x32xf32>
    %138 = arith.subf %125, %137 : vector<5x32xf32>
    %139 = arith.mulf %138, %138 : vector<5x32xf32>
    %cst_69 = arith.constant dense<0.000000e+00> : vector<5xf32>
    %140 = vector.multi_reduction <add>, %139, %cst_69 [1] : vector<5x32xf32> to vector<5xf32>
    %141 = vector.shape_cast %140 : vector<5xf32> to vector<5x1xf32>
    %cst_70 = arith.constant 3.200000e+01 : f32
    %142 = vector.broadcast %cst_70 : f32 to vector<5x1xf32>
    %143 = arith.divf %141, %142 : vector<5x1xf32>
    %144 = vector.broadcast %136 : vector<5x1xf32> to vector<5x32xf32>
    %145 = arith.subf %125, %144 : vector<5x32xf32>
    %cst_71 = arith.constant 9.99999996E-13 : f32
    %146 = vector.broadcast %cst_71 : f32 to vector<5x1xf32>
    %147 = arith.addf %143, %146 : vector<5x1xf32>
    %148 = math.rsqrt %147 : vector<5x1xf32>
    %149 = vector.broadcast %148 : vector<5x1xf32> to vector<5x32xf32>
    %150 = arith.mulf %145, %149 : vector<5x32xf32>
    %151 = vector.broadcast %126 : vector<1x32xf32> to vector<5x32xf32>
    %152 = arith.mulf %150, %151 : vector<5x32xf32>
    %153 = vector.broadcast %127 : vector<1x32xf32> to vector<5x32xf32>
    %154 = arith.addf %152, %153 : vector<5x32xf32>
    %155 = arith.truncf %154 : vector<5x32xf32> to vector<5x32xbf16>
    %156 = vector.shape_cast %155 : vector<5x32xbf16> to vector<1x5x32xbf16>
    %157 = vector.shape_cast %156 : vector<1x5x32xbf16> to vector<1x5x32xbf16>
    %158 = vector.broadcast %157 : vector<1x5x32xbf16> to vector<12x5x32xbf16>
    %c1_72 = arith.constant 1 : index
    %c0_73 = arith.constant 0 : index
    %c0_74 = arith.constant 0 : index
    %c0_75 = arith.constant 0 : index
    %159 = vector.load %arg5[%c1_72, %c0_73, %c0_74, %c0_75] : memref<2x12x32x8xf32, #tpu.memory_space<vmem>>, vector<1x12x32x8xf32>
    %160 = vector.shape_cast %159 : vector<1x12x32x8xf32> to vector<12x32x8xf32>
    %161 = arith.truncf %160 : vector<12x32x8xf32> to vector<12x32x8xbf16>
    "tpu.trace_start"() <{level = 10 : i32, message = "gsd,gde->gse"}> : () -> ()
    %cst_76 = arith.constant dense<0.000000e+00> : vector<12x5x8xf32>
    %162 = tpu.matmul %158, %161, %cst_76 {dimension_numbers = #tpu.dot_dimension_numbers<[2], [1], [1], [2], [0, 0, 0, 1, 1, 2], [0], [0]>} : vector<12x5x32xbf16>, vector<12x32x8xbf16>, vector<12x5x8xf32> -> vector<12x5x8xf32>
    "tpu.trace_stop"() : () -> ()
    %c1_77 = arith.constant 1 : index
    %c0_78 = arith.constant 0 : index
    %c0_79 = arith.constant 0 : index
    %c0_80 = arith.constant 0 : index
    %163 = vector.load %arg6[%c1_77, %c0_78, %c0_79, %c0_80] : memref<2x12x1x8xf32, #tpu.memory_space<vmem>>, vector<1x12x1x8xf32>
    %164 = vector.shape_cast %163 : vector<1x12x1x8xf32> to vector<12x1x8xf32>
    %165 = vector.broadcast %164 : vector<12x1x8xf32> to vector<12x5x8xf32>
    %166 = arith.addf %162, %165 : vector<12x5x8xf32>
    %167 = vector.extract_strided_slice %166 {offsets = [0, 0, 0], sizes = [4, 5, 8], strides = [1, 1, 1]} : vector<12x5x8xf32> to vector<4x5x8xf32>
    %168 = vector.extract_strided_slice %166 {offsets = [4, 0, 0], sizes = [4, 5, 8], strides = [1, 1, 1]} : vector<12x5x8xf32> to vector<4x5x8xf32>
    %169 = vector.extract_strided_slice %166 {offsets = [8, 0, 0], sizes = [4, 5, 8], strides = [1, 1, 1]} : vector<12x5x8xf32> to vector<4x5x8xf32>
    %170 = arith.truncf %167 : vector<4x5x8xf32> to vector<4x5x8xbf16>
    %171 = arith.truncf %168 : vector<4x5x8xf32> to vector<4x5x8xbf16>
    "tpu.trace_start"() <{level = 10 : i32, message = "hqe,hke->hqk"}> : () -> ()
    %cst_81 = arith.constant dense<0.000000e+00> : vector<4x5x5xf32>
    %172 = tpu.matmul %170, %171, %cst_81 {dimension_numbers = #tpu.dot_dimension_numbers<[2], [2], [1], [1], [0, 0, 0, 1, 1, 1], [0], [0]>} : vector<4x5x8xbf16>, vector<4x5x8xbf16>, vector<4x5x5xf32> -> vector<4x5x5xf32>
    "tpu.trace_stop"() : () -> ()
    %cst_82 = arith.constant 0.353553385 : f32
    %173 = vector.broadcast %cst_82 : f32 to vector<4x5x5xf32>
    %174 = arith.mulf %172, %173 : vector<4x5x5xf32>
    %cst_83 = arith.constant dense<0xFF800000> : vector<4x5xf32>
    %175 = vector.multi_reduction <maximumf>, %174, %cst_83 [2] : vector<4x5x5xf32> to vector<4x5xf32>
    %176 = vector.shape_cast %175 : vector<4x5xf32> to vector<4x5x1xf32>
    %177 = vector.broadcast %176 : vector<4x5x1xf32> to vector<4x5x5xf32>
    %178 = arith.subf %174, %177 : vector<4x5x5xf32>
    %179 = math.exp %178 : vector<4x5x5xf32>
    %cst_84 = arith.constant dense<0.000000e+00> : vector<4x5xf32>
    %180 = vector.multi_reduction <add>, %179, %cst_84 [2] : vector<4x5x5xf32> to vector<4x5xf32>
    %181 = vector.shape_cast %180 : vector<4x5xf32> to vector<4x5x1xf32>
    %182 = vector.broadcast %181 : vector<4x5x1xf32> to vector<4x5x5xf32>
    %183 = arith.divf %179, %182 : vector<4x5x5xf32>
    %c0_85 = arith.constant 0 : index
    %c1_86 = arith.constant 1 : index
    %c0_87 = arith.constant 0 : index
    %c0_88 = arith.constant 0 : index
    %c0_89 = arith.constant 0 : index
    %184 = vector.load %arg12[%c0_85, %c1_86, %c0_87, %c0_88, %c0_89] : memref<1x2x4x5x5xf32, #tpu.memory_space<vmem>>, vector<1x1x4x5x5xf32>
    %185 = vector.shape_cast %184 : vector<1x1x4x5x5xf32> to vector<4x5x5xf32>
    %186 = vector.shape_cast %183 : vector<4x5x5xf32> to vector<1x1x4x5x5xf32>
    tpu.vector_store %arg12[%c0_85, %c1_86, %c0_87, %c0_88, %c0_89], %186 {strides = array<i32>} : memref<1x2x4x5x5xf32, #tpu.memory_space<vmem>>, vector<1x1x4x5x5xf32>,
    %187 = arith.truncf %183 : vector<4x5x5xf32> to vector<4x5x5xbf16>
    %188 = arith.truncf %169 : vector<4x5x8xf32> to vector<4x5x8xbf16>
    "tpu.trace_start"() <{level = 10 : i32, message = "hqk,hke->hqe"}> : () -> ()
    %cst_90 = arith.constant dense<0.000000e+00> : vector<4x5x8xf32>
    %189 = tpu.matmul %187, %188, %cst_90 {dimension_numbers = #tpu.dot_dimension_numbers<[2], [1], [1], [2], [0, 0, 0, 1, 1, 2], [0], [0]>} : vector<4x5x5xbf16>, vector<4x5x8xbf16>, vector<4x5x8xf32> -> vector<4x5x8xf32>
    "tpu.trace_stop"() : () -> ()
    %190 = arith.truncf %189 : vector<4x5x8xf32> to vector<4x5x8xbf16>
    %c1_91 = arith.constant 1 : index
    %c0_92 = arith.constant 0 : index
    %c0_93 = arith.constant 0 : index
    %c0_94 = arith.constant 0 : index
    %191 = vector.load %arg7[%c1_91, %c0_92, %c0_93, %c0_94] : memref<2x4x8x32xf32, #tpu.memory_space<vmem>>, vector<1x4x8x32xf32>
    %192 = vector.shape_cast %191 : vector<1x4x8x32xf32> to vector<4x8x32xf32>
    %193 = arith.truncf %192 : vector<4x8x32xf32> to vector<4x8x32xbf16>
    "tpu.trace_start"() <{level = 10 : i32, message = "hse,heo->hso"}> : () -> ()
    %cst_95 = arith.constant dense<0.000000e+00> : vector<4x5x32xf32>
    %194 = tpu.matmul %190, %193, %cst_95 {dimension_numbers = #tpu.dot_dimension_numbers<[2], [1], [1], [2], [0, 0, 0, 1, 1, 2], [0], [0]>} : vector<4x5x8xbf16>, vector<4x8x32xbf16>, vector<4x5x32xf32> -> vector<4x5x32xf32>
    "tpu.trace_stop"() : () -> ()
    %cst_96 = arith.constant dense<0.000000e+00> : vector<5x32xf32>
    %195 = vector.multi_reduction <add>, %194, %cst_96 [0] : vector<4x5x32xf32> to vector<5x32xf32>
    %196 = arith.addf %125, %195 : vector<5x32xf32>
    %197 = vector.broadcast %128 : vector<1x32xf32> to vector<5x32xf32>
    %198 = arith.addf %196, %197 : vector<5x32xf32>
    %cst_97 = arith.constant dense<0.000000e+00> : vector<5xf32>
    %199 = vector.multi_reduction <add>, %198, %cst_97 [1] : vector<5x32xf32> to vector<5xf32>
    %200 = vector.shape_cast %199 : vector<5xf32> to vector<5x1xf32>
    %cst_98 = arith.constant 3.200000e+01 : f32
    %201 = vector.broadcast %cst_98 : f32 to vector<5x1xf32>
    %202 = arith.divf %200, %201 : vector<5x1xf32>
    %203 = vector.broadcast %202 : vector<5x1xf32> to vector<5x32xf32>
    %204 = arith.subf %198, %203 : vector<5x32xf32>
    %205 = arith.mulf %204, %204 : vector<5x32xf32>
    %cst_99 = arith.constant dense<0.000000e+00> : vector<5xf32>
    %206 = vector.multi_reduction <add>, %205, %cst_99 [1] : vector<5x32xf32> to vector<5xf32>
    %207 = vector.shape_cast %206 : vector<5xf32> to vector<5x1xf32>
    %cst_100 = arith.constant 3.200000e+01 : f32
    %208 = vector.broadcast %cst_100 : f32 to vector<5x1xf32>
    %209 = arith.divf %207, %208 : vector<5x1xf32>
    %210 = vector.broadcast %202 : vector<5x1xf32> to vector<5x32xf32>
    %211 = arith.subf %198, %210 : vector<5x32xf32>
    %cst_101 = arith.constant 9.99999996E-13 : f32
    %212 = vector.broadcast %cst_101 : f32 to vector<5x1xf32>
    %213 = arith.addf %209, %212 : vector<5x1xf32>
    %214 = math.rsqrt %213 : vector<5x1xf32>
    %215 = vector.broadcast %214 : vector<5x1xf32> to vector<5x32xf32>
    %216 = arith.mulf %211, %215 : vector<5x32xf32>
    %217 = vector.broadcast %129 : vector<1x32xf32> to vector<5x32xf32>
    %218 = arith.mulf %216, %217 : vector<5x32xf32>
    %219 = vector.broadcast %130 : vector<1x32xf32> to vector<5x32xf32>
    %220 = arith.addf %218, %219 : vector<5x32xf32>
    %221 = arith.truncf %220 : vector<5x32xf32> to vector<5x32xbf16>
    %c1_102 = arith.constant 1 : index
    %c0_103 = arith.constant 0 : index
    %c0_104 = arith.constant 0 : index
    %222 = vector.load %arg8[%c1_102, %c0_103, %c0_104] : memref<2x32x64xf32, #tpu.memory_space<vmem>>, vector<1x32x64xf32>
    %223 = vector.shape_cast %222 : vector<1x32x64xf32> to vector<32x64xf32>
    %224 = arith.truncf %223 : vector<32x64xf32> to vector<32x64xbf16>
    %cst_105 = arith.constant dense<0.000000e+00> : vector<5x64xf32>
    %225 = tpu.matmul %221, %224, %cst_105 {dimension_numbers = #tpu.dot_dimension_numbers<[1], [0], [0], [1], [0, 0, 1, 1], [], []>} : vector<5x32xbf16>, vector<32x64xbf16>, vector<5x64xf32> -> vector<5x64xf32>
    %226 = vector.broadcast %131 : vector<1x64xf32> to vector<5x64xf32>
    %227 = arith.addf %225, %226 : vector<5x64xf32>
    %cst_106 = arith.constant 5.000000e-01 : f32
    %228 = vector.broadcast %cst_106 : f32 to vector<5x64xf32>
    %229 = arith.mulf %228, %227 : vector<5x64xf32>
    %cst_107 = arith.constant 1.41421354 : f32
    %230 = vector.broadcast %cst_107 : f32 to vector<5x64xf32>
    %231 = arith.divf %227, %230 : vector<5x64xf32>
    %232 = math.erf %231 : vector<5x64xf32>
    %cst_108 = arith.constant 1.000000e+00 : f32
    %233 = vector.broadcast %cst_108 : f32 to vector<5x64xf32>
    %234 = arith.addf %233, %232 : vector<5x64xf32>
    %235 = arith.mulf %229, %234 : vector<5x64xf32>
    %236 = arith.truncf %235 : vector<5x64xf32> to vector<5x64xbf16>
    %c1_109 = arith.constant 1 : index
    %c0_110 = arith.constant 0 : index
    %c0_111 = arith.constant 0 : index
    %237 = vector.load %arg9[%c1_109, %c0_110, %c0_111] : memref<2x64x32xf32, #tpu.memory_space<vmem>>, vector<1x64x32xf32>
    %238 = vector.shape_cast %237 : vector<1x64x32xf32> to vector<64x32xf32>
    %239 = arith.truncf %238 : vector<64x32xf32> to vector<64x32xbf16>
    %cst_112 = arith.constant dense<0.000000e+00> : vector<5x32xf32>
    %240 = tpu.matmul %236, %239, %cst_112 {dimension_numbers = #tpu.dot_dimension_numbers<[1], [0], [0], [1], [0, 0, 1, 1], [], []>} : vector<5x64xbf16>, vector<64x32xbf16>, vector<5x32xf32> -> vector<5x32xf32>
    %241 = arith.addf %198, %240 : vector<5x32xf32>
    %242 = vector.broadcast %132 : vector<1x32xf32> to vector<5x32xf32>
    %243 = arith.addf %241, %242 : vector<5x32xf32>
    %244 = vector.extract_strided_slice %243 {offsets = [0, 0], sizes = [1, 32], strides = [1, 1]} : vector<5x32xf32> to vector<1x32xf32>
    %c16 = arith.constant 16 : index
    %c0_113 = arith.constant 0 : index
    %245 = vector.load %arg4[%c16, %c0_113] : memref<19x128xf32, #tpu.memory_space<vmem>>, vector<1x32xf32>
    %c17 = arith.constant 17 : index
    %c0_114 = arith.constant 0 : index
    %246 = vector.load %arg4[%c17, %c0_114] : memref<19x128xf32, #tpu.memory_space<vmem>>, vector<1x32xf32>
    %cst_115 = arith.constant dense<0.000000e+00> : vector<1xf32>
    %247 = vector.multi_reduction <add>, %244, %cst_115 [1] : vector<1x32xf32> to vector<1xf32>
    %248 = vector.shape_cast %247 : vector<1xf32> to vector<1x1xf32>
    %cst_116 = arith.constant 3.200000e+01 : f32
    %249 = vector.broadcast %cst_116 : f32 to vector<1x1xf32>
    %250 = arith.divf %248, %249 : vector<1x1xf32>
    %251 = vector.broadcast %250 : vector<1x1xf32> to vector<1x32xf32>
    %252 = arith.subf %244, %251 : vector<1x32xf32>
    %253 = arith.mulf %252, %252 : vector<1x32xf32>
    %cst_117 = arith.constant dense<0.000000e+00> : vector<1xf32>
    %254 = vector.multi_reduction <add>, %253, %cst_117 [1] : vector<1x32xf32> to vector<1xf32>
    %255 = vector.shape_cast %254 : vector<1xf32> to vector<1x1xf32>
    %cst_118 = arith.constant 3.200000e+01 : f32
    %256 = vector.broadcast %cst_118 : f32 to vector<1x1xf32>
    %257 = arith.divf %255, %256 : vector<1x1xf32>
    %258 = vector.broadcast %250 : vector<1x1xf32> to vector<1x32xf32>
    %259 = arith.subf %244, %258 : vector<1x32xf32>
    %cst_119 = arith.constant 9.99999996E-13 : f32
    %260 = vector.broadcast %cst_119 : f32 to vector<1x1xf32>
    %261 = arith.addf %257, %260 : vector<1x1xf32>
    %262 = math.rsqrt %261 : vector<1x1xf32>
    %263 = vector.broadcast %262 : vector<1x1xf32> to vector<1x32xf32>
    %264 = arith.mulf %259, %263 : vector<1x32xf32>
    %265 = arith.mulf %264, %245 : vector<1x32xf32>
    %266 = arith.addf %265, %246 : vector<1x32xf32>
    %c18 = arith.constant 18 : index
    %c0_120 = arith.constant 0 : index
    %267 = vector.load %arg4[%c18, %c0_120] : memref<19x128xf32, #tpu.memory_space<vmem>>, vector<1x128xf32>
    %268 = arith.truncf %266 : vector<1x32xf32> to vector<1x32xbf16>
    %c0_121 = arith.constant 0 : index
    %c0_122 = arith.constant 0 : index
    %269 = vector.load %arg10[%c0_121, %c0_122] : memref<32x128xf32, #tpu.memory_space<vmem>>, vector<32x128xf32>
    %270 = arith.truncf %269 : vector<32x128xf32> to vector<32x128xbf16>
    %cst_123 = arith.constant dense<0.000000e+00> : vector<1x128xf32>
    %271 = tpu.matmul %268, %270, %cst_123 {dimension_numbers = #tpu.dot_dimension_numbers<[1], [0], [0], [1], [0, 0, 1, 1], [], []>} : vector<1x32xbf16>, vector<32x128xbf16>, vector<1x128xf32> -> vector<1x128xf32>
    %272 = arith.addf %271, %267 : vector<1x128xf32>
    %c0_124 = arith.constant 0 : index
    %c0_125 = arith.constant 0 : index
    %c0_126 = arith.constant 0 : index
    %273 = vector.load %arg11[%c0_124, %c0_125, %c0_126] : memref<1x1x128xf32, #tpu.memory_space<vmem>>, vector<1x1x128xf32>
    %274 = vector.shape_cast %273 : vector<1x1x128xf32> to vector<1x128xf32>
    %275 = vector.shape_cast %272 : vector<1x128xf32> to vector<1x1x128xf32>
    tpu.vector_store %arg11[%c0_124, %c0_125, %c0_126], %275 {strides = array<i32>} : memref<1x1x128xf32, #tpu.memory_space<vmem>>, vector<1x1x128xf32>,
    return
  }
  func.func @transform_0(%arg0: i32) -> (i32, i32, i32) {
    %c0_i32 = arith.constant 0 : i32
    %c0_i32_0 = arith.constant 0 : i32
    %c0_i32_1 = arith.constant 0 : i32
    return %arg0, %c0_i32, %c0_i32_0 : i32, i32, i32
  }
  func.func @transform_1(%arg0: i32) -> (i32, i32) {
    %c0_i32 = arith.constant 0 : i32
    %c0_i32_0 = arith.constant 0 : i32
    %c0_i32_1 = arith.constant 0 : i32
    return %c0_i32, %c0_i32_0 : i32, i32
  }
  func.func @transform_2(%arg0: i32) -> (i32, i32) {
    %c0_i32 = arith.constant 0 : i32
    %c0_i32_0 = arith.constant 0 : i32
    %c0_i32_1 = arith.constant 0 : i32
    return %c0_i32, %c0_i32_0 : i32, i32
  }
  func.func @transform_3(%arg0: i32) -> (i32, i32) {
    %c0_i32 = arith.constant 0 : i32
    %c0_i32_0 = arith.constant 0 : i32
    %c0_i32_1 = arith.constant 0 : i32
    return %c0_i32, %c0_i32_0 : i32, i32
  }
  func.func @transform_4(%arg0: i32) -> (i32, i32, i32, i32) {
    %c0_i32 = arith.constant 0 : i32
    %c0_i32_0 = arith.constant 0 : i32
    %c0_i32_1 = arith.constant 0 : i32
    %c0_i32_2 = arith.constant 0 : i32
    %c0_i32_3 = arith.constant 0 : i32
    return %c0_i32, %c0_i32_0, %c0_i32_1, %c0_i32_2 : i32, i32, i32, i32
  }
  func.func @transform_5(%arg0: i32) -> (i32, i32, i32, i32) {
    %c0_i32 = arith.constant 0 : i32
    %c0_i32_0 = arith.constant 0 : i32
    %c0_i32_1 = arith.constant 0 : i32
    %c0_i32_2 = arith.constant 0 : i32
    %c0_i32_3 = arith.constant 0 : i32
    return %c0_i32, %c0_i32_0, %c0_i32_1, %c0_i32_2 : i32, i32, i32, i32
  }
  func.func @transform_6(%arg0: i32) -> (i32, i32, i32, i32) {
    %c0_i32 = arith.constant 0 : i32
    %c0_i32_0 = arith.constant 0 : i32
    %c0_i32_1 = arith.constant 0 : i32
    %c0_i32_2 = arith.constant 0 : i32
    %c0_i32_3 = arith.constant 0 : i32
    return %c0_i32, %c0_i32_0, %c0_i32_1, %c0_i32_2 : i32, i32, i32, i32
  }
  func.func @transform_7(%arg0: i32) -> (i32, i32, i32) {
    %c0_i32 = arith.constant 0 : i32
    %c0_i32_0 = arith.constant 0 : i32
    %c0_i32_1 = arith.constant 0 : i32
    %c0_i32_2 = arith.constant 0 : i32
    return %c0_i32, %c0_i32_0, %c0_i32_1 : i32, i32, i32
  }
  func.func @transform_8(%arg0: i32) -> (i32, i32, i32) {
    %c0_i32 = arith.constant 0 : i32
    %c0_i32_0 = arith.constant 0 : i32
    %c0_i32_1 = arith.constant 0 : i32
    %c0_i32_2 = arith.constant 0 : i32
    return %c0_i32, %c0_i32_0, %c0_i32_1 : i32, i32, i32
  }
  func.func @transform_9(%arg0: i32) -> (i32, i32) {
    %c0_i32 = arith.constant 0 : i32
    %c0_i32_0 = arith.constant 0 : i32
    %c0_i32_1 = arith.constant 0 : i32
    return %c0_i32, %c0_i32_0 : i32, i32
  }
  func.func @transform_10(%arg0: i32) -> (i32, i32, i32) {
    %c0_i32 = arith.constant 0 : i32
    %c0_i32_0 = arith.constant 0 : i32
    %c0_i32_1 = arith.constant 0 : i32
    return %arg0, %c0_i32, %c0_i32_0 : i32, i32, i32
  }
  func.func @transform_11(%arg0: i32) -> (i32, i32, i32, i32, i32) {
    %c0_i32 = arith.constant 0 : i32
    %c0_i32_0 = arith.constant 0 : i32
    %c0_i32_1 = arith.constant 0 : i32
    %c0_i32_2 = arith.constant 0 : i32
    %c0_i32_3 = arith.constant 0 : i32
    return %arg0, %c0_i32, %c0_i32_0, %c0_i32_1, %c0_i32_2 : i32, i32, i32, i32, i32
  }
}

</mosaic_0001>

<bundles_post_ra>
// kernel: vit_classifier_forward.1
= control target key start
LH: loop header
LB: loop body
LE: loop exit
PB: predicated region body
PF: predicated region fallthrough
CT: control target
= control target key end

     0   :  { %17 = vsyncpa [#allocation3], 0  ;;  %s5615_s0 = inlined_call_operand.vmem [shape: f32[2,5,192], index: 0, kind: input, shape index: {}]   ;;  %s5616_s1 = inlined_call_operand.vmem [shape: f32[192,32], index: 1, kind: input, shape index: {}]   ;;  %s5617_s2 = inlined_call_operand.vmem [shape: f32[5,32], index: 2, kind: input, shape index: {}]   ;;  %s5618_s3 = inlined_call_operand.vmem [shape: f32[19,128], index: 3, kind: input, shape index: {}]   ;;  %s5619_s4 = inlined_call_operand.vmem [shape: f32[2,12,32,8], index: 4, kind: input, shape index: {}]   ;;  %s5620_s5 = inlined_call_operand.vmem [shape: f32[2,12,1,8], index: 5, kind: input, shape index: {}]   ;;  %s5621_s6 = inlined_call_operand.vmem [shape: f32[2,4,8,32], index: 6, kind: input, shape index: {}]   ;;  %s5622_s7 = inlined_call_operand.vmem [shape: f32[2,32,64], index: 7, kind: input, shape index: {}]   ;;  %s5623_s8 = inlined_call_operand.vmem [shape: f32[2,64,32], index: 8, kind: input, shape index: {}]   ;;  %s5624_s9 = inlined_call_operand.vmem [shape: f32[32,128], index: 9, kind: input, shape index: {}]   ;;  %s5625_s10 = inlined_call_operand.hbm [shape: f32[2,1,128], index: 10, kind: output, shape index: {0}]   ;;  %s5626_s11 = inlined_call_operand.vmem [shape: f32[2,2,4,5,5], index: 11, kind: output, shape index: {1}]  }
   0x1   :  { %19 = vsyncpa [#allocation3 + $0x1], 0  ;;  %s4514_s17 = smov 0   ;;  %s4516_s18 = smov 0  }
   0x2   :  { %s4518_s19 = smov 0   ;;  %s4520_s20 = smov 0  }
   0x3 LB: > { %s4535_s21 = sadd.s32 4294967295, %s4447_s20   ;;  %s3590_s22 = sadd.s32 4294967294, %s4447_s20   ;;  %s4447_s20 = sphi %s4520_s20, %s5634_s20   ;;  %s4443_s19 = sphi %s4518_s19, %s5633_s19   ;;  %s4439_s18 = sphi %s4516_s18, %s5632_s18   ;;  %s4435_s17 = sphi %s4514_s17, %s5631_s17  }
   0x4   : > { %s4539_s23 = sadd.s32 1, %s4447_s20   ;;  %s247_s24 = sadd.s32 1, %s4443_s19 }
   0x5   : > { %s244_s25 = ssub.s32 %s4447_s20, %s4539_s23  ;;  %p257_p0 = scmp.ne.s32.totalorder %s4443_s19, %s4439_s18 }
   0x6   : > { %p245_p1 = scmp.eq.s32.totalorder %s244_s25, 0  ;;  %p258_p2 = scmp.eq.s32.totalorder %s4535_s21, 1 }
   0x7   : > { %p263_p3 = scmp.ne.s32.totalorder %s4439_s18, %s4435_s17  ;;  %p264_p4 = scmp.eq.s32.totalorder %s3590_s22, 1 }
   0x8   : > { %s4550_s26 = scalar_select %p245_p1, %s4443_s19, %s247_s24  }
   0x9   : > { %p4552_p5 = por %p258_p2, %p257_p0  ;;  %p4556_p6 = por %p264_p4, %p263_p3 }
   0xa   : > { %5627 = sst [smem:[#allocation5_spill]] %s4550_s26  ;;  %p3593_p7 = scmp.ge.s32.totalorder %s4447_s20, 1 }
   0xb   : > { %p343_p8 = scmp.lt.s32.totalorder %s4447_s20, 3 }
   0xd   : > { %p344_p9 = pnand %p3593_p7, %p343_p8 }
   0xe   : > { %p387_p10 = scmp.lt.s32.totalorder (!%p344_p9), %s4535_s21, 1  ;;  %s3770_s26 = sshll.u32 (!%p344_p9), %s4535_s21, 4 }
   0xf   : > { %347 = sbr.rel (%p344_p9) target bundleno = 5151 (0x141f), region = 60  ;;  %s5574_s22 = scalar_lea.hbm (!%p344_p9), %s5625_s10, %s3770_s26 }
  0x14   : > { %v416_v0 = vld [vmem:[%s5616_s1 + $0x70] sm:$0xff]  ;;  %v417_v1 = vld [vmem:[%s5616_s1 + $0x78] sm:$0xff]  ;;  %v414_v2 = vld [vmem:[%s5616_s1 + $0x60] sm:$0xff]  ;;  %v4449_v3 = vmov 0   ;;  %s4577_s24 = scalar_select %p387_p10, %s4535_s21, 1  ;;  %vm439_vm0 = vcmask 523264  }
  0x15   : > { %443 = vmatprep.subr.bf16.mxu0 %v4449_v3  ;;  %v433_v4 = vpack.c.bf16 %v417_v1, %v416_v0  ;;  %v415_v5 = vld [vmem:[%s5616_s1 + $0x68] sm:$0xff]  ;;  %v412_v7 = vld [vmem:[%s5616_s1 + $0x50] sm:$0xff]  ;;  %v413_v8 = vld [vmem:[%s5616_s1 + $0x58] sm:$0xff]  ;;  %vm490_vm1 = vcmask 258048   ;;  %v4450_v58 = vmov 0.0   ;;  %vm4451_vm2 = vmmov 0  }
  0x16   : > { %v432_v6 = vpack.c.bf16 %v415_v5, %v414_v2  ;;  %s3773_s13 = sshll.u32 %s4577_s24, 4  ;;  %v431_v9 = vpack.c.bf16 %v413_v8, %v412_v7  ;;  %v410_v10 = vld [vmem:[%s5616_s1 + $0x40] sm:$0xff]  ;;  %v411_v11 = vld [vmem:[%s5616_s1 + $0x48] sm:$0xff]  ;;  %v408_v15 = vld [vmem:[%s5616_s1 + $0x30] sm:$0xff]  ;;  %3914 = vmatprep.subr.bf16.mxu1 %v4450_v58  ;;  %3918 = vmatprep.mubr.msk.bf16.mxu1 %vm4451_vm2, %v4450_v58  ;;  %vm672_vm3 = vcmask 261120   ;;  %vm1164_vm4 = vcmask 64512  }
  0x17   : > { %444 = vmatpush1.bf16.msra.mxu0 %v433_v4  ;;  %s4590_s16 = scalar_lea.vmem %s5615_s0, %s3773_s13  ;;  %v430_v14 = vpack.c.bf16 %v411_v11, %v410_v10  ;;  %v409_v16 = vld [vmem:[%s5616_s1 + $0x38] sm:$0xff]  ;;  %v406_v18 = vld [vmem:[%s5616_s1 + $0x20] sm:$0xff]  ;;  %v407_v19 = vld [vmem:[%s5616_s1 + $0x28] sm:$0xff]  ;;  %vm1414_vm5 = vcmask 1041408   ;;  %vm1415_vm6 = vcmask 1042432   ;;  %vm1353_vm7 = vcmask 36864  }
  0x18   : > { %445 = vmatprep.subr.bf16.mxu0 %v4449_v3  ;;  %v399_v12 = vld [vmem:[%s4590_s16 + $0x8] sm:$0x1f]  ;;  %v429_v17 = vpack.c.bf16 %v409_v16, %v408_v15  ;;  %v428_v20 = vpack.c.bf16 %v407_v19, %v406_v18  ;;  %v404_v21 = vld [vmem:[%s5616_s1 + $0x10] sm:$0xff]  ;;  %v405_v22 = vld [vmem:[%s5616_s1 + $0x18] sm:$0xff]  ;;  %s3774_s29 = sshll.u32 %s4577_s24, 6  ;;  %vm1410_vm8 = vcmask 39936  }
  0x19   : > { %v401_v13 = vpack.c.bf16 %v399_v12, %v399_v12  ;;  %v427_v23 = vpack.c.bf16 %v405_v22, %v404_v21  ;;  %v402_v24 = vld [vmem:[%s5616_s1] sm:$0xff]  ;;  %v403_v25 = vld [vmem:[%s5616_s1 + $0x8] sm:$0xff]  ;;  %v424_v27 = vld [vmem:[%s5616_s1 + $0xb0] sm:$0xff]  ;;  %s4977_s13 = scalar_lea.vmem %s5626_s11, %s3774_s29  ;;  %vm1614_vm9 = vcmask 1043456   ;;  %vm3421_vm10 = vcmask 253952   ;;  %s378_s29 = sand.u32 1, %s4439_s18  }
  0x1a   : > { %v426_v26 = vpack.c.bf16 %v403_v25, %v402_v24  ;;  %v425_v28 = vld [vmem:[%s5616_s1 + $0xb8] sm:$0xff]  ;;  %v422_v30 = vld [vmem:[%s5616_s1 + $0xa0] sm:$0xff]  ;;  %v423_v31 = vld [vmem:[%s5616_s1 + $0xa8] sm:$0xff]  ;;  %s379_s14 = scalar_lea.vmem [#allocation2], %s378_s29  ;;  %s4453_s21 = smov [#allocation2]  }
  0x1b   : > { %446 = vmatpush1.bf16.msra.mxu0 %v432_v6  ;;  %3598 = vmatprep.mubr.msk.bf16.mxu0 %vm439_vm0, %v401_v13  ;;  %v437_v29 = vpack.c.bf16 %v425_v28, %v424_v27  ;;  %v436_v32 = vpack.c.bf16 %v423_v31, %v422_v30  ;;  %v420_v33 = vld [vmem:[%s5616_s1 + $0x90] sm:$0xff]  ;;  %v421_v34 = vld [vmem:[%s5616_s1 + $0x98] sm:$0xff]  ;;  %v418_v36 = vld [vmem:[%s5616_s1 + $0x80] sm:$0xff]  ;;  %s4391_s30 = sshll.u32 %s4453_s21, 4  ;;  %s4392_s30 = int_to_ptr.vmem [resolvable:$false] %s4391_s30 }
  0x1c   : > { %447 = vmatprep.subr.bf16.mxu0 %v4449_v3  ;;  %v435_v35 = vpack.c.bf16 %v421_v34, %v420_v33  ;;  %v419_v37 = vld [vmem:[%s5616_s1 + $0x88] sm:$0xff]  ;;  %v398_v39 = vld [vmem:[%s4590_s16] sm:$0x1f]  ;;  %v518_v53 = vld [vmem:[%s5619_s4 + $0x10] sm:$0xff]  ;;  %s3490_s16 = scalar_lea.sflag [#allocation3], %s378_s29  ;;  %s4393_s12 = scalar_lea.vmem %s4392_s30, 32 }
  0x1d   : > { %v434_v38 = vpack.c.bf16 %v419_v37, %v418_v36  ;;  %v400_v40 = vpack.c.bf16 %v398_v39, %v398_v39  ;;  %v438_v41 = vld [vmem:[%s5617_s2] sm:$0x1f]  ;;  %v519_v54 = vld [vmem:[%s5619_s4 + $0x18] sm:$0xff]  ;;  %v542_v55 = vld [vmem:[%s5619_s4 + $0xd0] sm:$0xff] }
  0x1e   : > { %v565_v56 = vpack.c.bf16 %v519_v54, %v518_v53  ;;  %v543_v57 = vld [vmem:[%s5619_s4 + $0xd8] sm:$0xff]  ;;  %v516_v60 = vld [vmem:[%s5619_s4] sm:$0xff]  ;;  %v517_v61 = vld [vmem:[%s5619_s4 + $0x8] sm:$0xff] }
  0x1f   : > { %448 = vmatpush1.bf16.msra.mxu0 %v431_v9  ;;  %v577_v59 = vpack.c.bf16 %v543_v57, %v542_v55  ;;  %v540_v62 = vld [vmem:[%s5619_s4 + $0xc0] sm:$0xff]  ;;  %v564_v63 = vpack.c.bf16 %v517_v61, %v516_v60  ;;  %v541_v0 = vld [vmem:[%s5619_s4 + $0xc8] sm:$0xff]  ;;  %v522_v9 = vld [vmem:[%s5619_s4 + $0x30] sm:$0xff] }
  0x20   : > { %449 = vmatprep.subr.bf16.mxu0 %v4449_v3  ;;  %3915 = vmatpush3.bf16.msra.mxu1 %v565_v56  ;;  %v576_v1 = vpack.c.bf16 %v541_v0, %v540_v62  ;;  %v3599_v6 = vld [vmem:[%s5618_s3] ss:$0 sm:$0xff]  ;;  %v3600_v8 = vld [vmem:[%s5618_s3 + $0x1] ss:$0 sm:$0xff]  ;;  %v523_v11 = vld [vmem:[%s5619_s4 + $0x38] sm:$0xff] }
  0x21   : > { %3916 = vmatprep.subr.bf16.mxu1 %v4450_v58  ;;  %v550_v12 = vld [vmem:[%s5619_s4 + $0x110] sm:$0xff]  ;;  %v551_v13 = vld [vmem:[%s5619_s4 + $0x118] sm:$0xff]  ;;  %v567_v15 = vpack.c.bf16 %v523_v11, %v522_v9  ;;  %v521_v19 = vld [vmem:[%s5619_s4 + $0x28] sm:$0xff] }
  0x22   : > { %v581_v16 = vpack.c.bf16 %v551_v13, %v550_v12  ;;  %v549_v21 = vld [vmem:[%s5619_s4 + $0x108] sm:$0xff]  ;;  %v526_v24 = vld [vmem:[%s5619_s4 + $0x50] sm:$0xff]  ;;  %v527_v25 = vld [vmem:[%s5619_s4 + $0x58] sm:$0xff] }
  0x23   : > { %450 = vmatpush1.bf16.msra.mxu0 %v430_v14  ;;  %v559_v27 = vld [vmem:[%s5619_s4 + $0x158] sm:$0xff]  ;;  %v569_v28 = vpack.c.bf16 %v527_v25, %v526_v24  ;;  %v524_v30 = vld [vmem:[%s5619_s4 + $0x40] sm:$0xff]  ;;  %v525_v31 = vld [vmem:[%s5619_s4 + $0x48] sm:$0xff] }
  0x24   : > { %451 = vmatprep.subr.bf16.mxu0 %v4449_v3  ;;  %3917 = vmatpush3.bf16.msra.mxu1 %v564_v63  ;;  %v557_v33 = vld [vmem:[%s5619_s4 + $0x148] sm:$0xff]  ;;  %v568_v34 = vpack.c.bf16 %v525_v31, %v524_v30  ;;  %v530_v36 = vld [vmem:[%s5619_s4 + $0x70] sm:$0xff]  ;;  %v531_v37 = vld [vmem:[%s5619_s4 + $0x78] sm:$0xff] }
  0x25   : > { %3922 = vmatprep.subr.bf16.mxu1 %v4450_v58  ;;  %v528_v39 = vld [vmem:[%s5619_s4 + $0x60] sm:$0xff]  ;;  %v537_v53 = vld [vmem:[%s5619_s4 + $0xa8] sm:$0xff]  ;;  %v546_v55 = vld [vmem:[%s5619_s4 + $0xf0] sm:$0xff] }
  0x26   : > { %v547_v56 = vld [vmem:[%s5619_s4 + $0xf8] sm:$0xff]  ;;  %v545_v60 = vld [vmem:[%s5619_s4 + $0xe8] sm:$0xff]  ;;  %v554_v62 = vld [vmem:[%s5619_s4 + $0x130] sm:$0xff] }
  0x27   : > { %452 = vmatpush1.bf16.msra.mxu0 %v429_v17  ;;  %v520_v17 = vld [vmem:[%s5619_s4 + $0x20] sm:$0xff]  ;;  %v579_v57 = vpack.c.bf16 %v547_v56, %v546_v55  ;;  %v555_v63 = vld [vmem:[%s5619_s4 + $0x138] sm:$0xff] }
  0x28   : > { %453 = vmatprep.subr.bf16.mxu0 %v4449_v3  ;;  %v566_v22 = vpack.c.bf16 %v521_v19, %v520_v17  ;;  %v583_v0 = vpack.c.bf16 %v555_v63, %v554_v62  ;;  %v3603_v62 = vld [vmem:[%s5620_s5 + $0x2] ss:$0 sm:$0xff] }
  0x2b   : > { %454 = vmatpush1.bf16.msra.mxu0 %v428_v20  ;;  %v548_v20 = vld [vmem:[%s5619_s4 + $0x100] sm:$0xff] }
  0x2c   : > { %455 = vmatprep.subr.bf16.mxu0 %v4449_v3 }
  0x2f   : > { %456 = vmatpush1.bf16.msra.mxu0 %v427_v23  ;;  %v580_v23 = vpack.c.bf16 %v549_v21, %v548_v20 }
  0x30   : > { %457 = vmatprep.subr.bf16.mxu0 %v4449_v3 }
  0x33   : > { %458 = vmatpush1.bf16.msra.mxu0 %v426_v26  ;;  %v558_v26 = vld [vmem:[%s5619_s4 + $0x150] sm:$0xff] }
  0x34   : > { %467 = vmatprep.subr.bf16.mxu0 %v4449_v3 }
  0x37   : > { %468 = vmatpush2.bf16.msra.mxu0 %v437_v29  ;;  %v585_v29 = vpack.c.bf16 %v559_v27, %v558_v26 }
  0x38   : > { %469 = vmatprep.subr.bf16.mxu0 %v4449_v3 }
  0x3b   : > { %470 = vmatpush2.bf16.msra.mxu0 %v436_v32  ;;  %v556_v32 = vld [vmem:[%s5619_s4 + $0x140] sm:$0xff] }
  0x3c   : > { %471 = vmatprep.subr.bf16.mxu0 %v4449_v3 }
  0x3f   : > { %472 = vmatpush2.bf16.msra.mxu0 %v435_v35  ;;  %v584_v35 = vpack.c.bf16 %v557_v33, %v556_v32 }
  0x40   : > { %473 = vmatprep.subr.bf16.mxu0 %v4449_v3 }
  0x43   : > { %474 = vmatpush2.bf16.msra.mxu0 %v434_v38  ;;  %v571_v38 = vpack.c.bf16 %v531_v37, %v530_v36 }
  0x44   : > { %3962 = vmatprep.subr.bf16.mxu0 %v4450_v58 }
  0x46   : > { %476 = vmatmul.mubr.bf16.vlgmr.msra.gmra.mxu0 %v400_v40  ;;  %v529_v40 = vld [vmem:[%s5619_s4 + $0x68] sm:$0xff] }
  0x47   : > { %3963 = vmatpush3.bf16.msra.mxu0 %v577_v59  ;;  %3966 = vmatprep.mubr.msk.bf16.mxu0 %vm4451_vm2, %v4450_v58  ;;  %v544_v59 = vld [vmem:[%s5619_s4 + $0xe0] sm:$0xff] }
  0x48   : > { %3964 = vmatprep.subr.bf16.mxu0 %v4450_v58  ;;  %v578_v61 = vpack.c.bf16 %v545_v60, %v544_v59  ;;  %v3602_v60 = vld [vmem:[%s5620_s5 + $0x1] ss:$0 sm:$0xff] }
  0x4b   : > { %3965 = vmatpush3.bf16.msra.mxu0 %v576_v1  ;;  %v552_v1 = vld [vmem:[%s5619_s4 + $0x120] sm:$0xff] }
  0x4c   : > { %3978 = vmatprep.subr.bf16.mxu0 %v4450_v58 }
 0x106   : > { %v477_v42 = vpop.f32.mrf.mxu0 }
 0x107   : > { %v4662_v43 = vadd.f32 %v477_v42, %v438_v41  ;;  %v570_v41 = vpack.c.bf16 %v529_v40, %v528_v39  ;;  %v534_v42 = vld [vmem:[%s5619_s4 + $0x90] sm:$0xff] }
 0x108   : > { %v479_v44 = vpop.f32.mrf.mxu0 }
 0x109   : > { %v491_v45 = vsel %vm490_vm1, %v4662_v43, 0.0  ;;  %v535_v44 = vld [vmem:[%s5619_s4 + $0x98] sm:$0xff] }
 0x10a   : > { %v480_v46 = vpop.f32.mrf.mxu0  ;;  %492 = vadd.xlane.f32.xlu0 %v491_v45  ;;  %v573_v45 = vpack.c.bf16 %v535_v44, %v534_v42 }
 0x10b   : > { %v532_v46 = vld [vmem:[%s5619_s4 + $0x80] sm:$0xff] }
 0x10c   : > { %v481_v47 = vpop.f32.mrf.mxu0 }
 0x10d   : > { %v533_v47 = vld [vmem:[%s5619_s4 + $0x88] sm:$0xff] }
 0x193   : > { %v493_v48 = vpop.xlane.xlu0 %492 }
 0x194   : > { %v495_v49 = vmul.f32 0.03125, %v493_v48  ;;  %v572_v48 = vpack.c.bf16 %v533_v47, %v532_v46 }
 0x196   : > { %v496_v50 = vsub.f32 %v4662_v43, %v495_v49  ;;  %v538_v49 = vld [vmem:[%s5619_s4 + $0xb0] sm:$0xff] }
 0x198   : > { %v497_v51 = vmul.f32 %v496_v50, %v496_v50 }
 0x19a   : > { %v498_v52 = vsel %vm490_vm1, %v497_v51, 0.0 }
 0x19b   : > { %499 = vadd.xlane.f32.xlu0 %v498_v52  ;;  %v536_v52 = vld [vmem:[%s5619_s4 + $0xa0] sm:$0xff] }
 0x19c   : > { %v574_v54 = vpack.c.bf16 %v537_v53, %v536_v52 }
 0x224   : > { %v500_v2 = vpop.xlane.xlu0 %499 }
 0x225   : > { %v501_v3 = vmul.f32 0.03125, %v500_v2  ;;  %v553_v2 = vld [vmem:[%s5619_s4 + $0x128] sm:$0xff] }
 0x227   : > { %v502_v4 = vadd.f32 1e-12, %v501_v3  ;;  %v582_v3 = vpack.c.bf16 %v553_v2, %v552_v1  ;;  %v4452_v2 = vmov 65535  }
 0x229   : > { %4341 = vrsqrt.f32 %v502_v4  ;;  %v562_v4 = vld [vmem:[%s5619_s4 + $0x170] sm:$0xff] }
 0x236   : > { %v4342_v5 = vpop.eup %4341 }
 0x237   : > { %v504_v7 = vmul.f32 %v4342_v5, %v496_v50  ;;  %v539_v50 = vld [vmem:[%s5619_s4 + $0xb8] sm:$0xff] }
 0x238   : > { %v575_v51 = vpack.c.bf16 %v539_v50, %v538_v49  ;;  %v563_v5 = vld [vmem:[%s5619_s4 + $0x178] sm:$0xff]  ;;  %v3606_v50 = vld [vmem:[%s5620_s5 + $0x5] ss:$0 sm:$0xff] }
 0x239   : > { %v509_v10 = vmul.f32 %v3599_v6, %v504_v7  ;;  %v587_v6 = vpack.c.bf16 %v563_v5, %v562_v4  ;;  %v560_v7 = vld [vmem:[%s5619_s4 + $0x160] sm:$0xff] }
 0x23a   : > { %v3608_v5 = vld [vmem:[%s5620_s5 + $0x7] ss:$0 sm:$0xff] }
 0x23b   : > { %v514_v14 = vadd.f32 %v3600_v8, %v509_v10  ;;  %v561_v8 = vld [vmem:[%s5619_s4 + $0x168] sm:$0xff] }
 0x23c   : > { %v586_v9 = vpack.c.bf16 %v561_v8, %v560_v7 }
 0x23d   : > { %v4723_v18 = vpack.c.bf16 %v514_v14, %v514_v14 }
 0x23f   : > { %3919 = vmatmul.mubr.msk.bf16.vlgmr.msra.gmra.mxu1 %vm672_vm3, %v4723_v18  ;;  %3967 = vmatmul.mubr.msk.bf16.vlgmr.msra.gmra.mxu0 %vm672_vm3, %v4723_v18 }
 0x240   : > { %3923 = vmatpush3.bf16.msra.mxu1 %v567_v15  ;;  %3979 = vmatpush3.bf16.msra.mxu0 %v581_v16 }
 0x241   : > { %3924 = vmatprep.subr.bf16.mxu1 %v4450_v58  ;;  %3980 = vmatprep.subr.bf16.mxu0 %v4450_v58 }
 0x242   : > { %3926 = vmatprep.mubr.msk.bf16.mxu1 %vm4451_vm2, %v4450_v58  ;;  %3982 = vmatprep.mubr.msk.bf16.mxu0 %vm4451_vm2, %v4450_v58 }
 0x244   : > { %3925 = vmatpush3.bf16.msra.mxu1 %v566_v22  ;;  %3981 = vmatpush3.bf16.msra.mxu0 %v580_v23 }
 0x245   : > { %3930 = vmatprep.subr.bf16.mxu1 %v4450_v58  ;;  %3994 = vmatprep.subr.bf16.mxu0 %v4450_v58 }
 0x247   : > { %3927 = vmatmul.mubr.msk.bf16.vlgmr.msra.gmra.mxu1 %vm672_vm3, %v4723_v18  ;;  %3983 = vmatmul.mubr.msk.bf16.vlgmr.msra.gmra.mxu0 %vm672_vm3, %v4723_v18 }
 0x248   : > { %3931 = vmatpush3.bf16.msra.mxu1 %v569_v28  ;;  %3995 = vmatpush3.bf16.msra.mxu0 %v585_v29 }
 0x249   : > { %3932 = vmatprep.subr.bf16.mxu1 %v4450_v58  ;;  %3996 = vmatprep.subr.bf16.mxu0 %v4450_v58 }
 0x24a   : > { %3934 = vmatprep.mubr.msk.bf16.mxu1 %vm4451_vm2, %v4450_v58  ;;  %3998 = vmatprep.mubr.msk.bf16.mxu0 %vm4451_vm2, %v4450_v58 }
 0x24c   : > { %3933 = vmatpush3.bf16.msra.mxu1 %v568_v34  ;;  %3997 = vmatpush3.bf16.msra.mxu0 %v584_v35 }
 0x24d   : > { %3938 = vmatprep.subr.bf16.mxu1 %v4450_v58  ;;  %4010 = vmatprep.subr.bf16.mxu0 %v4450_v58 }
 0x24f   : > { %3935 = vmatmul.mubr.msk.bf16.vlgmr.msra.gmra.mxu1 %vm672_vm3, %v4723_v18  ;;  %3999 = vmatmul.mubr.msk.bf16.vlgmr.msra.gmra.mxu0 %vm672_vm3, %v4723_v18 }
 0x250   : > { %3939 = vmatpush3.bf16.msra.mxu1 %v571_v38  ;;  %3942 = vmatprep.mubr.msk.bf16.mxu1 %vm4451_vm2, %v4450_v58  ;;  %v3605_v38 = vld [vmem:[%s5620_s5 + $0x4] ss:$0 sm:$0xff] }
 0x251   : > { %3940 = vmatprep.subr.bf16.mxu1 %v4450_v58  ;;  %4012 = vmatprep.mubr.msk.bf16.mxu0 %vm4451_vm2, %v4450_v58 }
 0x254   : > { %3941 = vmatpush3.bf16.msra.mxu1 %v570_v41  ;;  %v3607_v41 = vld [vmem:[%s5620_s5 + $0x6] ss:$0 sm:$0xff] }
 0x255   : > { %3946 = vmatprep.subr.bf16.mxu1 %v4450_v58 }
 0x257   : > { %3943 = vmatmul.mubr.msk.bf16.vlgmr.msra.gmra.mxu1 %vm672_vm3, %v4723_v18 }
 0x258   : > { %3947 = vmatpush3.bf16.msra.mxu1 %v573_v45  ;;  %3950 = vmatprep.mubr.msk.bf16.mxu1 %vm4451_vm2, %v4450_v58  ;;  %v3601_v45 = vld [vmem:[%s5620_s5] ss:$0 sm:$0xff] }
 0x259   : > { %3948 = vmatprep.subr.bf16.mxu1 %v4450_v58 }
 0x25c   : > { %3949 = vmatpush3.bf16.msra.mxu1 %v572_v48 }
 0x25d   : > { %3954 = vmatprep.subr.bf16.mxu1 %v4450_v58 }
 0x25f   : > { %3951 = vmatmul.mubr.msk.bf16.vlgmr.msra.gmra.mxu1 %vm672_vm3, %v4723_v18 }
 0x260   : > { %3955 = vmatpush3.bf16.msra.mxu1 %v575_v51  ;;  %3958 = vmatprep.mubr.msk.bf16.mxu1 %vm4451_vm2, %v4450_v58 }
 0x261   : > { %3956 = vmatprep.subr.bf16.mxu1 %v4450_v58 }
 0x264   : > { %3957 = vmatpush3.bf16.msra.mxu1 %v574_v54  ;;  %v3609_v54 = vld [vmem:[%s5620_s5 + $0x8] ss:$0 sm:$0xff] }
 0x265   : > { %3970 = vmatprep.subr.bf16.mxu1 %v4450_v58 }
 0x267   : > { %3959 = vmatmul.mubr.msk.bf16.vlgmr.msra.gmra.mxu1 %vm672_vm3, %v4723_v18 }
 0x268   : > { %3971 = vmatpush3.bf16.msra.mxu1 %v579_v57  ;;  %3974 = vmatprep.mubr.msk.bf16.mxu1 %vm4451_vm2, %v4450_v58 }
 0x269   : > { %3972 = vmatprep.subr.bf16.mxu1 %v4450_v58 }
 0x26c   : > { %3973 = vmatpush3.bf16.msra.mxu1 %v578_v61 }
 0x26d   : > { %3986 = vmatprep.subr.bf16.mxu1 %v4450_v58 }
 0x26f   : > { %3975 = vmatmul.mubr.msk.bf16.vlgmr.msra.gmra.mxu1 %vm672_vm3, %v4723_v18 }
 0x270   : > { %3987 = vmatpush3.bf16.msra.mxu1 %v583_v0  ;;  %3990 = vmatprep.mubr.msk.bf16.mxu1 %vm4451_vm2, %v4450_v58 }
 0x271   : > { %3988 = vmatprep.subr.bf16.mxu1 %v4450_v58 }
 0x274   : > { %3989 = vmatpush3.bf16.msra.mxu1 %v582_v3  ;;  %v1416_v3 = vsel %vm1414_vm5, 4294967295, %v4452_v2 }
 0x275   : > { %4002 = vmatprep.subr.bf16.mxu1 %v4450_v58 }
 0x277   : > { %3991 = vmatmul.mubr.msk.bf16.vlgmr.msra.gmra.mxu1 %vm672_vm3, %v4723_v18 }
 0x278   : > { %4003 = vmatpush3.bf16.msra.mxu1 %v587_v6  ;;  %4006 = vmatprep.mubr.msk.bf16.mxu1 %vm4451_vm2, %v4450_v58 }
 0x279   : > { %4004 = vmatprep.subr.bf16.mxu1 %v4450_v58 }
 0x27c   : > { %4005 = vmatpush3.bf16.msra.mxu1 %v586_v9 }
 0x27d   : > { %4016 = vmatprep.subr.bf16.mxu1 %v4450_v58 }
 0x27f   : > { %4007 = vmatmul.mubr.msk.bf16.vlgmr.msra.gmra.mxu1 %vm672_vm3, %v4723_v18 }
 0x280   : > { %4018 = vmatprep.mubr.msk.bf16.mxu1 %vm4451_vm2, %v4450_v58 }
 0x2ff   : > { %v710_v10 = vpop.f32.mrf.mxu1  ;;  %v950_v11 = vpop.f32.mrf.mxu0 }
 0x300   : > { %v951_v47 = vadd.f32 %v3607_v41, %v950_v11  ;;  %v711_v51 = vadd.f32 %v3601_v45, %v710_v10  ;;  %v4935_v10 = vsel %vm1415_vm6, %v1416_v3, 0 }
 0x301   : > { %v3920_v12 = vpop.f32.mrf.mxu1  ;;  %v3968_v13 = vpop.f32.mrf.mxu0 }
 0x302   : > { %v1162_v53 = vpack.c.bf16 %v951_v47, %v951_v47  ;;  %v1156_v57 = vpack.c.bf16 %v711_v51, %v711_v51 }
 0x303   : > { %v713_v14 = vpop.f32.mrf.mxu1  ;;  %v953_v15 = vpop.f32.mrf.mxu0 }
 0x304   : > { %v1261_v0 = vsel %vm1164_vm4, %v1162_v53, 0 }
 0x305   : > { %v3921_v16 = vpop.f32.mrf.mxu1  ;;  %v3969_v17 = vpop.f32.mrf.mxu0 }
 0x306   : > { %v3604_v17 = vld [vmem:[%s5620_s5 + $0x3] ss:$0 sm:$0xff] }
 0x307   : > { %v750_v19 = vpop.f32.mrf.mxu1  ;;  %v1030_v20 = vpop.f32.mrf.mxu0 }
 0x308   : > { %v1031_v61 = vadd.f32 %v3609_v54, %v1030_v20  ;;  %v751_v6 = vadd.f32 %v3602_v60, %v750_v19 }
 0x309   : > { %v3928_v21 = vpop.f32.mrf.mxu1  ;;  %v3984_v22 = vpop.f32.mrf.mxu0 }
 0x30a   : > { %v1406_v8 = vpack.c.bf16 %v1031_v61, %v1031_v61  ;;  %v1157_v13 = vpack.c.bf16 %v751_v6, %v751_v6  ;;  %v3610_v22 = vld [vmem:[%s5620_s5 + $0x9] ss:$0 sm:$0xff] }
 0x30b   : > { %v753_v23 = vpop.f32.mrf.mxu1  ;;  %v1033_v24 = vpop.f32.mrf.mxu0 }
 0x30c   : > { %v1419_v16 = vand.u32 %v4935_v10, %v1406_v8 }
 0x30d   : > { %v3929_v25 = vpop.f32.mrf.mxu1  ;;  %v3985_v26 = vpop.f32.mrf.mxu0 }
 0x30f   : > { %v790_v18 = vpop.f32.mrf.mxu1  ;;  %v4898_v27 = vpop.f32.mrf.mxu0 }
 0x310   : > { %v791_v7 = vadd.f32 %v3603_v62, %v790_v18 }
 0x311   : > { %v3936_v28 = vpop.f32.mrf.mxu1  ;;  %v4000_v29 = vpop.f32.mrf.mxu0 }
 0x312   : > { %v1158_v14 = vpack.c.bf16 %v791_v7, %v791_v7 }
 0x313   : > { %v793_v30 = vpop.f32.mrf.mxu1  ;;  %v1113_v31 = vpop.f32.mrf.mxu0 }
 0x315   : > { %v3937_v32 = vpop.f32.mrf.mxu1  ;;  %v4001_v33 = vpop.f32.mrf.mxu0 }
 0x317   : > { %v4900_v34 = vpop.f32.mrf.mxu1 }
 0x318   : > { %v831_v23 = vadd.f32 %v3604_v17, %v4900_v34 }
 0x319   : > { %v3944_v35 = vpop.f32.mrf.mxu1 }
 0x31a   : > { %v1159_v18 = vpack.c.bf16 %v831_v23, %v831_v23 }
 0x31b   : > { %v833_v36 = vpop.f32.mrf.mxu1 }
 0x31d   : > { %v3945_v37 = vpop.f32.mrf.mxu1 }
 0x31f   : > { %v870_v39 = vpop.f32.mrf.mxu1 }
 0x320   : > { %v871_v40 = vadd.f32 %v3605_v38, %v870_v39 }
 0x321   : > { %v3952_v42 = vpop.f32.mrf.mxu1 }
 0x322   : > { %v1160_v44 = vpack.c.bf16 %v871_v40, %v871_v40 }
 0x323   : > { %v873_v46 = vpop.f32.mrf.mxu1 }
 0x324   : > { %v1169_v48 = vsel %vm1164_vm4, %v1160_v44, 0 }
 0x325   : > { %v3953_v49 = vpop.f32.mrf.mxu1  ;;  %4011 = vmatpush3.bf16.xpose.msra.mxu0 %v1169_v48 }
 0x326   : > { %4022 = vmatprep.subr.bf16.mxu0 %v4450_v58 }
 0x327   : > { %v910_v52 = vpop.f32.mrf.mxu1 }
 0x328   : > { %v911_v55 = vadd.f32 %v3606_v50, %v910_v52 }
 0x329   : > { %v3960_v56 = vpop.f32.mrf.mxu1 }
 0x32a   : > { %v1161_v59 = vpack.c.bf16 %v911_v55, %v911_v55 }
 0x32b   : > { %v913_v63 = vpop.f32.mrf.mxu1 }
 0x32c   : > { %v1215_v1 = vsel %vm1164_vm4, %v1161_v59, 0  ;;  %4013 = vmatmul.mubr.msk.bf16.vlgmr.msra.gmra.mxu0 %vm1164_vm4, %v1156_v57 }
 0x32d   : > { %v3961_v4 = vpop.f32.mrf.mxu1  ;;  %4017 = vmatpush3.bf16.xpose.msra.mxu1 %v1215_v1  ;;  %4023 = vmatpush3.bf16.xpose.msra.mxu0 %v1261_v0 }
 0x32e   : > { %4024 = vmatprep.mubr.msk.bf16.mxu0 %vm4451_vm2, %v4450_v58  ;;  %4028 = vmatprep.subr.bf16.mxu1 %v4450_v58 }
 0x32f   : > { %v990_v9 = vpop.f32.mrf.mxu1  ;;  %4034 = vmatprep.subr.bf16.mxu0 %v4450_v58 }
 0x330   : > { %v991_v11 = vadd.f32 %v3608_v5, %v990_v9 }
 0x331   : > { %v3976_v12 = vpop.f32.mrf.mxu1 }
 0x332   : > { %v1163_v15 = vpack.c.bf16 %v991_v11, %v991_v11 }
 0x333   : > { %v993_v19 = vpop.f32.mrf.mxu1 }
 0x334   : > { %v1307_v20 = vsel %vm1164_vm4, %v1163_v15, 0  ;;  %4019 = vmatmul.mubr.msk.bf16.vlgmr.msra.gmra.mxu1 %vm1164_vm4, %v1157_v13  ;;  %4025 = vmatmul.mubr.msk.bf16.vlgmr.msra.gmra.mxu0 %vm1164_vm4, %v1158_v14 }
 0x335   : > { %v3977_v21 = vpop.f32.mrf.mxu1  ;;  %4029 = vmatpush3.bf16.xpose.msra.mxu1 %v1307_v20  ;;  %4035 = vmatpush3.bf16.msra.mxu0 %v1419_v16 }
 0x336   : > { %4030 = vmatprep.mubr.msk.bf16.mxu1 %vm4451_vm2, %v4450_v58  ;;  %4040 = vmatprep.subr.bf16.mxu1 %v4450_v58  ;;  %v3611_v21 = vld [vmem:[%s5620_s5 + $0xa] ss:$0 sm:$0xff] }
 0x337   : > { %v1070_v24 = vpop.f32.mrf.mxu1  ;;  %4036 = vmatprep.mubr.msk.bf16.mxu0 %vm4451_vm2, %v4450_v58  ;;  %4046 = vmatprep.subr.bf16.mxu0 %v4450_v58 }
 0x338   : > { %v1071_v25 = vadd.f32 %v3610_v22, %v1070_v24  ;;  %v1111_v24 = vadd.f32 %v3611_v21, %v4898_v27 }
 0x339   : > { %v3992_v26 = vpop.f32.mrf.mxu1 }
 0x33a   : > { %v1407_v28 = vpack.c.bf16 %v1071_v25, %v1071_v25  ;;  %v1408_v26 = vpack.c.bf16 %v1111_v24, %v1111_v24 }
 0x33b   : > { %v1073_v29 = vpop.f32.mrf.mxu1 }
 0x33c   : > { %v1465_v30 = vand.u32 %v4935_v10, %v1407_v28  ;;  %4031 = vmatmul.mubr.msk.bf16.vlgmr.msra.gmra.mxu1 %vm1164_vm4, %v1159_v18  ;;  %v3612_v28 = vld [vmem:[%s5620_s5 + $0xb] ss:$0 sm:$0xff] }
 0x33d   : > { %v3993_v31 = vpop.f32.mrf.mxu1  ;;  %4042 = vmatprep.mubr.msk.bf16.mxu1 %vm4451_vm2, %v4450_v58 }
 0x33e   : > { %4041 = vmatpush3.bf16.msra.mxu1 %v1465_v30  ;;  %v1511_v30 = vand.u32 %v4935_v10, %v1408_v26 }
 0x33f   : > { %v4958_v32 = vpop.f32.mrf.mxu1  ;;  %4052 = vmatprep.subr.bf16.mxu1 %v4450_v58 }
 0x340   : > { %v1151_v31 = vadd.f32 %v3612_v28, %v4958_v32 }
 0x341   : > { %v4008_v33 = vpop.f32.mrf.mxu1 }
 0x343   : > { %v1153_v34 = vpop.f32.mrf.mxu1 }
 0x345   : > { %v4009_v35 = vpop.f32.mrf.mxu1 }
 0x346   : > { %v1409_v35 = vpack.c.bf16 %v1151_v31, %v1151_v31 }
 0x3ec   : > { %v1205_v36 = vpop.f32.mrf.mxu0 }
 0x3ed   : > { %v1349_v37 = vmul.f32 0.35355338, %v1205_v36 }
 0x3ee   : > { %v4014_v38 = vpop.f32.mrf.mxu0 }
 0x3ef   : > { %v1354_v39 = vsel %vm1353_vm7, %v1349_v37, -inf }
 0x3f0   : > { %1355 = vmax.xlane.f32.xlu1 %v1354_v39  ;;  %v1208_v40 = vpop.f32.mrf.mxu0  ;;  %v1557_v39 = vand.u32 %v4935_v10, %v1409_v35 }
 0x3f2   : > { %v4015_v41 = vpop.f32.mrf.mxu0 }
 0x3f4   : > { %v1251_v42 = vpop.f32.mrf.mxu1  ;;  %v1297_v44 = vpop.f32.mrf.mxu0 }
 0x3f5   : > { %v1350_v45 = vmul.f32 0.35355338, %v1251_v42  ;;  %v1351_v46 = vmul.f32 0.35355338, %v1297_v44  ;;  %v1603_v44 = vld [vmem:[%s5621_s6] sm:$0xff] }
 0x3f6   : > { %v4020_v47 = vpop.f32.mrf.mxu1  ;;  %v4026_v48 = vpop.f32.mrf.mxu0 }
 0x3f7   : > { %v1360_v49 = vsel %vm1353_vm7, %v1351_v46, -inf  ;;  %v1357_v50 = vsel %vm1353_vm7, %v1350_v45, -inf  ;;  %v1604_v47 = vld [vmem:[%s5621_s6 + $0x8] sm:$0xff] }
 0x3f8   : > { %1361 = vmax.xlane.f32.xlu0 %v1360_v49  ;;  %v1300_v51 = vpop.f32.mrf.mxu0  ;;  %1358 = vmax.xlane.f32.xlu1 %v1357_v50  ;;  %v1254_v52 = vpop.f32.mrf.mxu1  ;;  %v1608_v48 = vpack.c.bf16 %v1604_v47, %v1604_v47  ;;  %v1605_v50 = vld [vmem:[%s5621_s6 + $0x10] sm:$0xff]  ;;  %v1836_v47 = vld [vmem:[%s5622_s7 + $0x18] sm:$0xff] }
 0x3f9   : > { %v1609_v51 = vpack.c.bf16 %v1605_v50, %v1605_v50  ;;  %v1834_v50 = vld [vmem:[%s5622_s7 + $0x8] sm:$0xff] }
 0x3fa   : > { %v4021_v53 = vpop.f32.mrf.mxu1  ;;  %v4027_v54 = vpop.f32.mrf.mxu0  ;;  %v1662_v49 = vsel %vm1614_vm9, %v1608_v48, 0 }
 0x3fb   : > { %v1708_v54 = vsel %vm1614_vm9, %v1609_v51, 0 }
 0x3fc   : > { %v1343_v55 = vpop.f32.mrf.mxu1 }
 0x3fd   : > { %v1352_v56 = vmul.f32 0.35355338, %v1343_v55 }
 0x3fe   : > { %v4032_v57 = vpop.f32.mrf.mxu1 }
 0x3ff   : > { %v1363_v59 = vsel %vm1353_vm7, %v1352_v56, -inf }
 0x400   : > { %1364 = vmax.xlane.f32.xlu1 %v1363_v59  ;;  %v1346_v60 = vpop.f32.mrf.mxu1 }
 0x402   : > { %v4033_v61 = vpop.f32.mrf.mxu1 }
 0x479   : > { %v1356_v62 = vpop.xlane.xlu1 %1355 }
 0x47a   : > { %v1366_v63 = vsub.f32 %v1349_v37, %v1356_v62 }
 0x47c   : > { %v1370_v0 = vmul.f32 1.442695, %v1366_v63 }
 0x47e   : > { %4343 = vpow2.f32 %v1370_v0 }
 0x481   : > { %v1362_v1 = vpop.xlane.xlu0 %1361  ;;  %v1359_v2 = vpop.xlane.xlu1 %1358 }
 0x482   : > { %v1368_v3 = vsub.f32 %v1351_v46, %v1362_v1  ;;  %v1367_v4 = vsub.f32 %v1350_v45, %v1359_v2  ;;  %v1607_v45 = vpack.c.bf16 %v1603_v44, %v1603_v44 }
 0x484   : > { %v1374_v5 = vmul.f32 1.442695, %v1368_v3  ;;  %v1372_v6 = vmul.f32 1.442695, %v1367_v4  ;;  %v1616_v46 = vsel %vm1614_vm9, %v1607_v45, 0 }
 0x486   : > { %4345 = vpow2.f32 %v1374_v5 }
 0x487   : > { %4347 = vpow2.f32 %v1372_v6 }
 0x489   : > { %v1365_v7 = vpop.xlane.xlu1 %1364 }
 0x48a   : > { %v1369_v8 = vsub.f32 %v1352_v56, %v1365_v7  ;;  %v1606_v56 = vld [vmem:[%s5621_s6 + $0x18] sm:$0xff] }
 0x48b   : > { %v4344_v9 = vpop.eup %4343  ;;  %v1610_v60 = vpack.c.bf16 %v1606_v56, %v1606_v56  ;;  %v3638_v56 = vld [vmem:[%s5618_s3 + $0x3] ss:$0 sm:$0xff] }
 0x48c   : > { %v1376_v11 = vmul.f32 1.442695, %v1369_v8  ;;  %v1378_v12 = vsel %vm1353_vm7, %v4344_v9, 0.0 }
 0x48d   : > { %1379 = vadd.xlane.f32.xlu0 %v1378_v12  ;;  %v1754_v2 = vsel %vm1614_vm9, %v1610_v60, 0 }
 0x48e   : > { %4349 = vpow2.f32 %v1376_v11 }
 0x493   : > { %v4346_v13 = vpop.eup %4345 }
 0x494   : > { %v4348_v14 = vpop.eup %4347  ;;  %v1384_v15 = vsel %vm1353_vm7, %v4346_v13, 0.0 }
 0x495   : > { %1385 = vadd.xlane.f32.xlu0 %v1384_v15  ;;  %v1381_v16 = vsel %vm1353_vm7, %v4348_v14, 0.0 }
 0x496   : > { %1382 = vadd.xlane.f32.xlu1 %v1381_v16 }
 0x49b   : > { %v4350_v17 = vpop.eup %4349 }
 0x49c   : > { %v1387_v19 = vsel %vm1353_vm7, %v4350_v17, 0.0 }
 0x49d   : > { %1388 = vadd.xlane.f32.xlu1 %v1387_v19 }
 0x516   : > { %v1380_v20 = vpop.xlane.xlu0 %1379 }
 0x517   : > { %4351 = vrcp.f32 %v1380_v20 }
 0x51e   : > { %v1386_v22 = vpop.xlane.xlu0 %1385 }
 0x51f   : > { %4353 = vrcp.f32 %v1386_v22  ;;  %v1383_v23 = vpop.xlane.xlu1 %1382 }
 0x520   : > { %4355 = vrcp.f32 %v1383_v23 }
 0x524   : > { %v4352_v25 = vpop.eup %4351 }
 0x525   : > { %v1391_v18 = vmul.f32 %v4352_v25, %v4344_v9 }
 0x526   : > { %v1389_v29 = vpop.xlane.xlu1 %1388 }
 0x527   : > { %4357 = vrcp.f32 %v1389_v29  ;;  %1398 = vst.msk [vmem:[%s4977_s13] sm:$0x1f] %vm1353_vm7, %v1391_v18  ;;  %v1402_v27 = vpack.c.bf16 %v1391_v18, %v1391_v18 }
 0x529   : > { %4037 = vmatmul.mubr.msk.bf16.vlgmr.msra.gmra.mxu0 %vm1410_vm8, %v1402_v27 }
 0x52a   : > { %4047 = vmatpush3.bf16.msra.mxu0 %v1511_v30  ;;  %4048 = vmatprep.mubr.msk.bf16.mxu0 %vm4451_vm2, %v4450_v58 }
 0x52b   : > { %4058 = vmatprep.subr.bf16.mxu0 %v4450_v58 }
 0x52c   : > { %v4354_v33 = vpop.eup %4353 }
 0x52d   : > { %v4356_v34 = vpop.eup %4355  ;;  %v1395_v36 = vmul.f32 %v4354_v33, %v4346_v13 }
 0x52e   : > { %v1393_v37 = vmul.f32 %v4356_v34, %v4348_v14 }
 0x52f   : > { %1400 = vst.msk [vmem:[%s4977_s13 + $0x10] sm:$0x1f] %vm1353_vm7, %v1395_v36  ;;  %v1404_v38 = vpack.c.bf16 %v1395_v36, %v1395_v36  ;;  %v3637_v36 = vld [vmem:[%s5618_s3 + $0x2] ss:$0 sm:$0xff] }
 0x530   : > { %1399 = vst.msk [vmem:[%s4977_s13 + $0x8] sm:$0x1f] %vm1353_vm7, %v1393_v37  ;;  %v1403_v32 = vpack.c.bf16 %v1393_v37, %v1393_v37 }
 0x531   : > { %4049 = vmatmul.mubr.msk.bf16.vlgmr.msra.gmra.mxu0 %vm1410_vm8, %v1404_v38 }
 0x532   : > { %4043 = vmatmul.mubr.msk.bf16.vlgmr.msra.gmra.mxu1 %vm1410_vm8, %v1403_v32  ;;  %4060 = vmatprep.mubr.msk.bf16.mxu0 %vm4451_vm2, %v4450_v58 }
 0x533   : > { %4053 = vmatpush3.bf16.msra.mxu1 %v1557_v39  ;;  %4054 = vmatprep.mubr.msk.bf16.mxu1 %vm4451_vm2, %v4450_v58 }
 0x534   : > { %v4358_v40 = vpop.eup %4357  ;;  %4064 = vmatprep.subr.bf16.mxu1 %v4450_v58  ;;  %4059 = vmatpush3.bf16.msra.mxu0 %v1616_v46 }
 0x535   : > { %v1397_v41 = vmul.f32 %v4358_v40, %v4350_v17  ;;  %4070 = vmatprep.subr.bf16.mxu0 %v4450_v58 }
 0x537   : > { %1401 = vst.msk [vmem:[%s4977_s13 + $0x18] sm:$0x1f] %vm1353_vm7, %v1397_v41  ;;  %v1405_v42 = vpack.c.bf16 %v1397_v41, %v1397_v41 }
 0x53a   : > { %4055 = vmatmul.mubr.msk.bf16.vlgmr.msra.gmra.mxu1 %vm1410_vm8, %v1405_v42 }
 0x53b   : > { %4066 = vmatprep.mubr.msk.bf16.mxu1 %vm4451_vm2, %v4450_v58  ;;  %4065 = vmatpush3.bf16.msra.mxu1 %v1662_v49  ;;  %v1833_v49 = vld [vmem:[%s5622_s7] sm:$0xff] }
 0x53c   : > { %4076 = vmatprep.subr.bf16.mxu1 %v4450_v58  ;;  %v1837_v51 = vpack.c.bf16 %v1834_v50, %v1833_v49 }
 0x5e9   : > { %v1455_v52 = vpop.f32.mrf.mxu0 }
 0x5ea   : > { %v1599_v53 = vpack.c.bf16 %v1455_v52, %v1455_v52 }
 0x5eb   : > { %v4038_v55 = vpop.f32.mrf.mxu0 }
 0x5ec   : > { %4061 = vmatmul.mubr.msk.bf16.vlgmr.msra.gmra.mxu0 %vm1164_vm4, %v1599_v53 }
 0x5ed   : > { %v1458_v57 = vpop.f32.mrf.mxu0  ;;  %4071 = vmatpush3.bf16.msra.mxu0 %v1708_v54  ;;  %4072 = vmatprep.mubr.msk.bf16.mxu0 %vm4451_vm2, %v4450_v58 }
 0x5ee   : > { %4082 = vmatprep.subr.bf16.mxu0 %v4450_v58 }
 0x5ef   : > { %v4039_v59 = vpop.f32.mrf.mxu0 }
 0x5f0   : > { %v3639_v59 = vld [vmem:[%s5618_s3 + $0x4] ss:$0 sm:$0xff] }
 0x5f1   : > { %v1547_v61 = vpop.f32.mrf.mxu0 }
 0x5f2   : > { %v1501_v62 = vpop.f32.mrf.mxu1  ;;  %v1601_v63 = vpack.c.bf16 %v1547_v61, %v1547_v61 }
 0x5f3   : > { %v1600_v0 = vpack.c.bf16 %v1501_v62, %v1501_v62  ;;  %v4050_v1 = vpop.f32.mrf.mxu0 }
 0x5f4   : > { %v4044_v3 = vpop.f32.mrf.mxu1  ;;  %4073 = vmatmul.mubr.msk.bf16.vlgmr.msra.gmra.mxu0 %vm1164_vm4, %v1601_v63  ;;  %v1899_v63 = vld [vmem:[%s5623_s8 + $0x30] sm:$0xff] }
 0x5f5   : > { %4067 = vmatmul.mubr.msk.bf16.vlgmr.msra.gmra.mxu1 %vm1164_vm4, %v1600_v0  ;;  %v1550_v4 = vpop.f32.mrf.mxu0  ;;  %4086 = vmatprep.mubr.msk.bf16.mxu0 %vm4451_vm2, %v4450_v58  ;;  %v1900_v0 = vld [vmem:[%s5623_s8 + $0x38] sm:$0xff]  ;;  %v1898_v3 = vld [vmem:[%s5623_s8 + $0x28] sm:$0xff] }
 0x5f6   : > { %v1504_v5 = vpop.f32.mrf.mxu1  ;;  %4077 = vmatpush3.bf16.msra.mxu1 %v1754_v2  ;;  %4078 = vmatprep.mubr.msk.bf16.mxu1 %vm4451_vm2, %v4450_v58  ;;  %v1904_v1 = vpack.c.bf16 %v1900_v0, %v1899_v63  ;;  %v1897_v2 = vld [vmem:[%s5623_s8 + $0x20] sm:$0xff] }
 0x5f7   : > { %v4051_v6 = vpop.f32.mrf.mxu0  ;;  %4090 = vmatprep.subr.bf16.mxu1 %v4450_v58  ;;  %v1903_v4 = vpack.c.bf16 %v1898_v3, %v1897_v2  ;;  %v1895_v5 = vld [vmem:[%s5623_s8 + $0x10] sm:$0xff]  ;;  %v3651_v3 = vld [vmem:[%s5619_s4 + $0x1a8] sm:$0xff] }
 0x5f8   : > { %v4045_v7 = vpop.f32.mrf.mxu1  ;;  %v1896_v6 = vld [vmem:[%s5623_s8 + $0x18] sm:$0xff] }
 0x5f9   : > { %v1902_v7 = vpack.c.bf16 %v1896_v6, %v1895_v5  ;;  %v3663_v5 = vld [vmem:[%s5619_s4 + $0x208] sm:$0xff] }
 0x5fa   : > { %v1593_v8 = vpop.f32.mrf.mxu1 }
 0x5fb   : > { %v1602_v9 = vpack.c.bf16 %v1593_v8, %v1593_v8  ;;  %v1893_v8 = vld [vmem:[%s5623_s8] sm:$0xff] }
 0x5fc   : > { %v4056_v11 = vpop.f32.mrf.mxu1 }
 0x5fd   : > { %4079 = vmatmul.mubr.msk.bf16.vlgmr.msra.gmra.mxu1 %vm1164_vm4, %v1602_v9  ;;  %v1894_v9 = vld [vmem:[%s5623_s8 + $0x8] sm:$0xff] }
 0x5fe   : > { %v1596_v12 = vpop.f32.mrf.mxu1  ;;  %4098 = vmatprep.mubr.msk.bf16.mxu1 %vm4451_vm2, %v4450_v58  ;;  %4091 = vmatpush3.bf16.msra.mxu1 %v1904_v1  ;;  %v1901_v11 = vpack.c.bf16 %v1894_v9, %v1893_v8  ;;  %v3650_v1 = vld [vmem:[%s5619_s4 + $0x1a0] sm:$0xff]  ;;  %v3660_v8 = vld [vmem:[%s5619_s4 + $0x1f0] sm:$0xff]  ;;  %v3661_v9 = vld [vmem:[%s5619_s4 + $0x1f8] sm:$0xff] }
 0x5ff   : > { %4092 = vmatprep.subr.bf16.mxu1 %v4450_v58  ;;  %v3640_v12 = vld [vmem:[%s5618_s3 + $0x5] ss:$0 sm:$0xff]  ;;  %v2036_v6 = vpack.c.bf16 %v3651_v3, %v3650_v1 }
 0x600   : > { %v4057_v13 = vpop.f32.mrf.mxu1 }
 0x602   : > { %4093 = vmatpush3.bf16.msra.mxu1 %v1903_v4  ;;  %v3662_v4 = vld [vmem:[%s5619_s4 + $0x200] sm:$0xff] }
 0x603   : > { %4094 = vmatprep.subr.bf16.mxu1 %v4450_v58 }
 0x606   : > { %4095 = vmatpush3.bf16.msra.mxu1 %v1902_v7  ;;  %v2042_v7 = vpack.c.bf16 %v3663_v5, %v3662_v4  ;;  %v3710_v4 = vld [vmem:[%s5620_s5 + $0x10] ss:$0 sm:$0xff] }
 0x607   : > { %4096 = vmatprep.subr.bf16.mxu1 %v4450_v58 }
 0x60a   : > { %4097 = vmatpush3.bf16.msra.mxu1 %v1901_v11  ;;  %v3672_v11 = vld [vmem:[%s5619_s4 + $0x250] sm:$0xff] }
 0x60b   : > { %4118 = vmatprep.subr.bf16.mxu1 %v4450_v58 }
 0x6ac   : > { %v1652_v14 = vpop.f32.mrf.mxu0 }
 0x6ad   : > { %v1796_v24 = vsel %vm490_vm1, %v1652_v14, 0.0 }
 0x6ae   : > { %v4062_v15 = vpop.f32.mrf.mxu0 }
 0x6b0   : > { %v1655_v16 = vpop.f32.mrf.mxu0 }
 0x6b2   : > { %v4063_v17 = vpop.f32.mrf.mxu0 }
 0x6b4   : > { %v1744_v19 = vpop.f32.mrf.mxu0 }
 0x6b5   : > { %v1698_v20 = vpop.f32.mrf.mxu1  ;;  %v1799_v27 = vsel %vm490_vm1, %v1744_v19, 0.0 }
 0x6b6   : > { %v1797_v21 = vsel %vm490_vm1, %v1698_v20, 0.0  ;;  %v4074_v22 = vpop.f32.mrf.mxu0 }
 0x6b7   : > { %v4068_v23 = vpop.f32.mrf.mxu1  ;;  %v1798_v26 = vadd.f32 %v1797_v21, %v1796_v24 }
 0x6b8   : > { %v1747_v25 = vpop.f32.mrf.mxu0 }
 0x6b9   : > { %v1701_v18 = vpop.f32.mrf.mxu1  ;;  %v1800_v30 = vadd.f32 %v1799_v27, %v1798_v26  ;;  %v3643_v25 = vld [vmem:[%s5618_s3 + $0x6] ss:$0 sm:$0xff] }
 0x6ba   : > { %v4075_v28 = vpop.f32.mrf.mxu0 }
 0x6bb   : > { %v4069_v29 = vpop.f32.mrf.mxu1 }
 0x6bd   : > { %v1790_v31 = vpop.f32.mrf.mxu1 }
 0x6be   : > { %v1801_v33 = vsel %vm490_vm1, %v1790_v31, 0.0 }
 0x6bf   : > { %v1802_v34 = vadd.f32 %v1801_v33, %v1800_v30  ;;  %v4080_v35 = vpop.f32.mrf.mxu1 }
 0x6c1   : > { %v1803_v37 = vadd.f32 %v1802_v34, %v4662_v43  ;;  %v1793_v38 = vpop.f32.mrf.mxu1  ;;  %v1835_v43 = vld [vmem:[%s5622_s7 + $0x10] sm:$0xff] }
 0x6c2   : > { %v1838_v48 = vpack.c.bf16 %v1836_v47, %v1835_v43  ;;  %v3648_v38 = vld [vmem:[%s5619_s4 + $0x190] sm:$0xff]  ;;  %v3655_v47 = vld [vmem:[%s5619_s4 + $0x1c8] sm:$0xff] }
 0x6c3   : > { %v4081_v32 = vpop.f32.mrf.mxu1  ;;  %v5047_v39 = vadd.f32 %v3637_v36, %v1803_v37 }
 0x6c4   : > { %4083 = vmatpush3.bf16.msra.mxu0 %v1838_v48  ;;  %v3649_v32 = vld [vmem:[%s5619_s4 + $0x198] sm:$0xff] }
 0x6c5   : > { %v1809_v40 = vsel %vm490_vm1, %v5047_v39, 0.0  ;;  %4084 = vmatprep.subr.bf16.mxu0 %v4450_v58 }
 0x6c6   : > { %1810 = vadd.xlane.f32.xlu0 %v1809_v40  ;;  %v2035_v40 = vpack.c.bf16 %v3649_v32, %v3648_v38  ;;  %v3689_v38 = vld [vmem:[%s5619_s4 + $0x2d8] sm:$0xff] }
 0x6c8   : > { %4085 = vmatpush3.bf16.msra.mxu0 %v1837_v51 }
 0x6c9   : > { %4102 = vmatprep.subr.bf16.mxu0 %v4450_v58 }
 0x74f   : > { %v1811_v41 = vpop.xlane.xlu0 %1810 }
 0x750   : > { %v1812_v42 = vmul.f32 0.03125, %v1811_v41  ;;  %v3657_v41 = vld [vmem:[%s5619_s4 + $0x1d8] sm:$0xff] }
 0x752   : > { %v1813_v44 = vsub.f32 %v5047_v39, %v1812_v42 }
 0x754   : > { %v1814_v45 = vmul.f32 %v1813_v44, %v1813_v44 }
 0x756   : > { %v1815_v46 = vsel %vm490_vm1, %v1814_v45, 0.0  ;;  %v3647_v45 = vld [vmem:[%s5619_s4 + $0x188] sm:$0xff] }
 0x757   : > { %1816 = vadd.xlane.f32.xlu1 %v1815_v46  ;;  %v3654_v46 = vld [vmem:[%s5619_s4 + $0x1c0] sm:$0xff] }
 0x758   : > { %v2038_v48 = vpack.c.bf16 %v3655_v47, %v3654_v46  ;;  %v3685_v47 = vld [vmem:[%s5619_s4 + $0x2b8] sm:$0xff] }
 0x7e0   : > { %v1817_v52 = vpop.xlane.xlu1 %1816 }
 0x7e1   : > { %v1818_v53 = vmul.f32 0.03125, %v1817_v52 }
 0x7e3   : > { %v1819_v54 = vadd.f32 1e-12, %v1818_v53  ;;  %v3644_v53 = vld [vmem:[%s5618_s3 + $0x8] ss:$0 sm:$0xff] }
 0x7e5   : > { %4359 = vrsqrt.f32 %v1819_v54 }
 0x7f2   : > { %v4360_v55 = vpop.eup %4359 }
 0x7f3   : > { %v1821_v57 = vmul.f32 %v4360_v55, %v1813_v44  ;;  %v3646_v44 = vld [vmem:[%s5619_s4 + $0x180] sm:$0xff]  ;;  %v3645_v55 = vld [vmem:[%s5618_s3 + $0x9] ss:$0 sm:$0xff] }
 0x7f4   : > { %v2034_v43 = vpack.c.bf16 %v3647_v45, %v3646_v44  ;;  %v3687_v44 = vld [vmem:[%s5619_s4 + $0x2c8] sm:$0xff] }
 0x7f5   : > { %v1826_v60 = vmul.f32 %v3638_v56, %v1821_v57  ;;  %v3652_v56 = vld [vmem:[%s5619_s4 + $0x1b0] sm:$0xff] }
 0x7f7   : > { %v1831_v61 = vadd.f32 %v3639_v59, %v1826_v60  ;;  %v3653_v59 = vld [vmem:[%s5619_s4 + $0x1b8] sm:$0xff]  ;;  %v3664_v60 = vld [vmem:[%s5619_s4 + $0x210] sm:$0xff] }
 0x7f8   : > { %v2037_v63 = vpack.c.bf16 %v3653_v59, %v3652_v56  ;;  %v3691_v56 = vld [vmem:[%s5619_s4 + $0x2e8] sm:$0xff] }
 0x7f9   : > { %v1832_v62 = vpack.c.bf16 %v1831_v61, %v1831_v61  ;;  %v3665_v61 = vld [vmem:[%s5619_s4 + $0x218] sm:$0xff] }
 0x7fa   : > { %v2043_v0 = vpack.c.bf16 %v3665_v61, %v3664_v60 }
 0x7fb   : > { %4087 = vmatmul.mubr.msk.bf16.vlgmr.msra.gmra.mxu0 %vm672_vm3, %v1832_v62 }
 0x7fc   : > { %4106 = vmatprep.mubr.msk.bf16.mxu0 %vm4451_vm2, %v4450_v58  ;;  %4103 = vmatpush3.bf16.msra.mxu0 %v2035_v40  ;;  %v3674_v40 = vld [vmem:[%s5619_s4 + $0x260] sm:$0xff] }
 0x7fd   : > { %4104 = vmatprep.subr.bf16.mxu0 %v4450_v58 }
 0x800   : > { %4105 = vmatpush3.bf16.msra.mxu0 %v2034_v43  ;;  %v3684_v43 = vld [vmem:[%s5619_s4 + $0x2b0] sm:$0xff] }
 0x801   : > { %4110 = vmatprep.subr.bf16.mxu0 %v4450_v58 }
 0x8bb   : > { %v1880_v13 = vpop.f32.mrf.mxu0 }
 0x8bc   : > { %v1881_v14 = vadd.f32 %v3640_v12, %v1880_v13  ;;  %v3673_v12 = vld [vmem:[%s5619_s4 + $0x258] sm:$0xff]  ;;  %v2041_v13 = vpack.c.bf16 %v3661_v9, %v3660_v8 }
 0x8bd   : > { %v4088_v15 = vpop.f32.mrf.mxu0 }
 0x8be   : > { %v1888_v16 = vmul.f32 0.70710677, %v1881_v14  ;;  %v1886_v21 = vmul.f32 0.5, %v1881_v14  ;;  %v2047_v14 = vpack.c.bf16 %v3673_v12, %v3672_v11  ;;  %v3658_v15 = vld [vmem:[%s5619_s4 + $0x1e0] sm:$0xff]  ;;  %v3706_v11 = vld [vmem:[%s5620_s5 + $0xc] ss:$0 sm:$0xff] }
 0x8bf   : > { %v1883_v17 = vpop.f32.mrf.mxu0 }
 0x8c0   : > { %4361 = verf.f32 %v1888_v16  ;;  %v3659_v16 = vld [vmem:[%s5619_s4 + $0x1e8] sm:$0xff]  ;;  %v3670_v17 = vld [vmem:[%s5619_s4 + $0x240] sm:$0xff] }
 0x8c1   : > { %v4089_v19 = vpop.f32.mrf.mxu0 }
 0x8c2   : > { %v3671_v19 = vld [vmem:[%s5619_s4 + $0x248] sm:$0xff] }
 0x8cd   : > { %v4362_v20 = vpop.eup %4361 }
 0x8ce   : > { %v1890_v22 = vadd.f32 1.0, %v4362_v20  ;;  %v2040_v20 = vpack.c.bf16 %v3659_v16, %v3658_v15 }
 0x8d0   : > { %v1891_v23 = vmul.f32 %v1890_v22, %v1886_v21  ;;  %v2046_v21 = vpack.c.bf16 %v3671_v19, %v3670_v17  ;;  %v3668_v22 = vld [vmem:[%s5619_s4 + $0x230] sm:$0xff] }
 0x8d1   : > { %v3712_v17 = vld [vmem:[%s5620_s5 + $0x12] ss:$0 sm:$0xff] }
 0x8d2   : > { %v1892_v24 = vpack.c.bf16 %v1891_v23, %v1891_v23  ;;  %v3669_v23 = vld [vmem:[%s5619_s4 + $0x238] sm:$0xff] }
 0x8d4   : > { %4099 = vmatmul.mubr.msk.bf16.vlgmr.msra.gmra.mxu1 %vm439_vm0, %v1892_v24  ;;  %v3680_v24 = vld [vmem:[%s5619_s4 + $0x290] sm:$0xff] }
 0x8d5   : > { %4122 = vmatprep.mubr.msk.bf16.mxu1 %vm4451_vm2, %v4450_v58 }
 0x994   : > { %v1942_v26 = vpop.f32.mrf.mxu1 }
 0x995   : > { %v1948_v18 = vadd.f32 %v1942_v26, %v5047_v39  ;;  %v3656_v39 = vld [vmem:[%s5619_s4 + $0x1d0] sm:$0xff]  ;;  %v2045_v26 = vpack.c.bf16 %v3669_v23, %v3668_v22 }
 0x996   : > { %v4100_v28 = vpop.f32.mrf.mxu1  ;;  %v2039_v42 = vpack.c.bf16 %v3657_v41, %v3656_v39  ;;  %v3675_v41 = vld [vmem:[%s5619_s4 + $0x268] sm:$0xff] }
 0x997   : > { %v5114_v29 = vadd.f32 %v3643_v25, %v1948_v18  ;;  %v3681_v25 = vld [vmem:[%s5619_s4 + $0x298] sm:$0xff]  ;;  %v3666_v28 = vld [vmem:[%s5619_s4 + $0x220] sm:$0xff]  ;;  %v2048_v45 = vpack.c.bf16 %v3675_v41, %v3674_v40 }
 0x998   : > { %v1945_v27 = vpop.f32.mrf.mxu1  ;;  %4119 = vmatpush3.bf16.msra.mxu1 %v2039_v42  ;;  %v2051_v18 = vpack.c.bf16 %v3681_v25, %v3680_v24  ;;  %v3686_v42 = vld [vmem:[%s5619_s4 + $0x2c0] sm:$0xff] }
 0x999   : > { %v1961_v30 = vsel %vm490_vm1, %v5114_v29, 0.0  ;;  %4120 = vmatprep.subr.bf16.mxu1 %v4450_v58  ;;  %v3667_v27 = vld [vmem:[%s5619_s4 + $0x228] sm:$0xff]  ;;  %v2054_v46 = vpack.c.bf16 %v3687_v44, %v3686_v42 }
 0x99a   : > { %1962 = vadd.xlane.f32.xlu0 %v1961_v30  ;;  %v4101_v31 = vpop.f32.mrf.mxu1  ;;  %v3678_v30 = vld [vmem:[%s5619_s4 + $0x280] sm:$0xff] }
 0x99b   : > { %v3679_v31 = vld [vmem:[%s5619_s4 + $0x288] sm:$0xff] }
 0x99c   : > { %4121 = vmatpush3.bf16.msra.mxu1 %v2038_v48  ;;  %v2053_v48 = vpack.c.bf16 %v3685_v47, %v3684_v43 }
 0x99d   : > { %4134 = vmatprep.subr.bf16.mxu1 %v4450_v58 }
 0xa23   : > { %v1963_v33 = vpop.xlane.xlu0 %1962 }
 0xa24   : > { %v1964_v34 = vmul.f32 0.03125, %v1963_v33  ;;  %v2044_v33 = vpack.c.bf16 %v3667_v27, %v3666_v28 }
 0xa26   : > { %v1965_v35 = vsub.f32 %v5114_v29, %v1964_v34  ;;  %v2050_v34 = vpack.c.bf16 %v3679_v31, %v3678_v30 }
 0xa28   : > { %v1966_v36 = vmul.f32 %v1965_v35, %v1965_v35 }
 0xa2a   : > { %v1967_v37 = vsel %vm490_vm1, %v1966_v36, 0.0  ;;  %v3677_v36 = vld [vmem:[%s5619_s4 + $0x278] sm:$0xff] }
 0xa2b   : > { %1968 = vadd.xlane.f32.xlu1 %v1967_v37  ;;  %v3688_v37 = vld [vmem:[%s5619_s4 + $0x2d0] sm:$0xff] }
 0xa2c   : > { %v2055_v39 = vpack.c.bf16 %v3689_v38, %v3688_v37 }
 0xab4   : > { %v1969_v49 = vpop.xlane.xlu1 %1968 }
 0xab5   : > { %v1970_v50 = vmul.f32 0.03125, %v1969_v49  ;;  %v3682_v49 = vld [vmem:[%s5619_s4 + $0x2a0] sm:$0xff] }
 0xab7   : > { %v1971_v51 = vadd.f32 1e-12, %v1970_v50  ;;  %v3683_v50 = vld [vmem:[%s5619_s4 + $0x2a8] sm:$0xff] }
 0xab9   : > { %4363 = vrsqrt.f32 %v1971_v51  ;;  %v2052_v51 = vpack.c.bf16 %v3683_v50, %v3682_v49 }
 0xac6   : > { %v4364_v52 = vpop.eup %4363 }
 0xac7   : > { %v1973_v54 = vmul.f32 %v4364_v52, %v1965_v35  ;;  %v3676_v35 = vld [vmem:[%s5619_s4 + $0x270] sm:$0xff] }
 0xac8   : > { %v2049_v32 = vpack.c.bf16 %v3677_v36, %v3676_v35  ;;  %v3692_v52 = vld [vmem:[%s5619_s4 + $0x2f0] sm:$0xff] }
 0xac9   : > { %v1978_v57 = vmul.f32 %v3644_v53, %v1973_v54  ;;  %v3693_v53 = vld [vmem:[%s5619_s4 + $0x2f8] sm:$0xff]  ;;  %v3714_v35 = vld [vmem:[%s5620_s5 + $0x14] ss:$0 sm:$0xff] }
 0xaca   : > { %v2057_v54 = vpack.c.bf16 %v3693_v53, %v3692_v52  ;;  %v3713_v52 = vld [vmem:[%s5620_s5 + $0x13] ss:$0 sm:$0xff] }
 0xacb   : > { %v1983_v62 = vadd.f32 %v3645_v55, %v1978_v57  ;;  %v3690_v55 = vld [vmem:[%s5619_s4 + $0x2e0] sm:$0xff] }
 0xacc   : > { %v2056_v57 = vpack.c.bf16 %v3691_v56, %v3690_v55 }
 0xacd   : > { %v5169_v2 = vpack.c.bf16 %v1983_v62, %v1983_v62 }
 0xacf   : > { %4107 = vmatmul.mubr.msk.bf16.vlgmr.msra.gmra.mxu0 %vm672_vm3, %v5169_v2  ;;  %4123 = vmatmul.mubr.msk.bf16.vlgmr.msra.gmra.mxu1 %vm672_vm3, %v5169_v2 }
 0xad0   : > { %4111 = vmatpush3.bf16.msra.mxu0 %v2037_v63  ;;  %4135 = vmatpush3.bf16.msra.mxu1 %v2043_v0 }
 0xad1   : > { %4112 = vmatprep.subr.bf16.mxu0 %v4450_v58  ;;  %4136 = vmatprep.subr.bf16.mxu1 %v4450_v58 }
 0xad2   : > { %4114 = vmatprep.mubr.msk.bf16.mxu0 %vm4451_vm2, %v4450_v58  ;;  %4138 = vmatprep.mubr.msk.bf16.mxu1 %vm4451_vm2, %v4450_v58 }
 0xad4   : > { %4113 = vmatpush3.bf16.msra.mxu0 %v2036_v6  ;;  %4137 = vmatpush3.bf16.msra.mxu1 %v2042_v7 }
 0xad5   : > { %4126 = vmatprep.subr.bf16.mxu0 %v4450_v58  ;;  %4150 = vmatprep.subr.bf16.mxu1 %v4450_v58 }
 0xad7   : > { %4115 = vmatmul.mubr.msk.bf16.vlgmr.msra.gmra.mxu0 %vm672_vm3, %v5169_v2  ;;  %4139 = vmatmul.mubr.msk.bf16.vlgmr.msra.gmra.mxu1 %vm672_vm3, %v5169_v2 }
 0xad8   : > { %4127 = vmatpush3.bf16.msra.mxu0 %v2041_v13  ;;  %4151 = vmatpush3.bf16.msra.mxu1 %v2047_v14 }
 0xad9   : > { %4128 = vmatprep.subr.bf16.mxu0 %v4450_v58  ;;  %4152 = vmatprep.subr.bf16.mxu1 %v4450_v58 }
 0xada   : > { %4130 = vmatprep.mubr.msk.bf16.mxu0 %vm4451_vm2, %v4450_v58  ;;  %4154 = vmatprep.mubr.msk.bf16.mxu1 %vm4451_vm2, %v4450_v58 }
 0xadc   : > { %4129 = vmatpush3.bf16.msra.mxu0 %v2040_v20  ;;  %4153 = vmatpush3.bf16.msra.mxu1 %v2046_v21 }
 0xadd   : > { %4142 = vmatprep.subr.bf16.mxu0 %v4450_v58  ;;  %4166 = vmatprep.subr.bf16.mxu1 %v4450_v58 }
 0xadf   : > { %4131 = vmatmul.mubr.msk.bf16.vlgmr.msra.gmra.mxu0 %vm672_vm3, %v5169_v2  ;;  %4155 = vmatmul.mubr.msk.bf16.vlgmr.msra.gmra.mxu1 %vm672_vm3, %v5169_v2 }
 0xae0   : > { %4143 = vmatpush3.bf16.msra.mxu0 %v2045_v26  ;;  %4167 = vmatpush3.bf16.msra.mxu1 %v2051_v18  ;;  %v3708_v18 = vld [vmem:[%s5620_s5 + $0xe] ss:$0 sm:$0xff] }
 0xae1   : > { %4144 = vmatprep.subr.bf16.mxu0 %v4450_v58  ;;  %4168 = vmatprep.subr.bf16.mxu1 %v4450_v58 }
 0xae2   : > { %4146 = vmatprep.mubr.msk.bf16.mxu0 %vm4451_vm2, %v4450_v58  ;;  %4170 = vmatprep.mubr.msk.bf16.mxu1 %vm4451_vm2, %v4450_v58 }
 0xae4   : > { %4145 = vmatpush3.bf16.msra.mxu0 %v2044_v33  ;;  %4169 = vmatpush3.bf16.msra.mxu1 %v2050_v34  ;;  %v3711_v34 = vld [vmem:[%s5620_s5 + $0x11] ss:$0 sm:$0xff] }
 0xae5   : > { %4158 = vmatprep.subr.bf16.mxu0 %v4450_v58  ;;  %4182 = vmatprep.subr.bf16.mxu1 %v4450_v58 }
 0xae7   : > { %4147 = vmatmul.mubr.msk.bf16.vlgmr.msra.gmra.mxu0 %vm672_vm3, %v5169_v2  ;;  %4171 = vmatmul.mubr.msk.bf16.vlgmr.msra.gmra.mxu1 %vm672_vm3, %v5169_v2 }
 0xae8   : > { %4159 = vmatpush3.bf16.msra.mxu0 %v2049_v32  ;;  %4183 = vmatpush3.bf16.msra.mxu1 %v2055_v39 }
 0xae9   : > { %4160 = vmatprep.subr.bf16.mxu0 %v4450_v58  ;;  %4184 = vmatprep.subr.bf16.mxu1 %v4450_v58 }
 0xaea   : > { %4162 = vmatprep.mubr.msk.bf16.mxu0 %vm4451_vm2, %v4450_v58  ;;  %4186 = vmatprep.mubr.msk.bf16.mxu1 %vm4451_vm2, %v4450_v58 }
 0xaec   : > { %4161 = vmatpush3.bf16.msra.mxu0 %v2048_v45  ;;  %4185 = vmatpush3.bf16.msra.mxu1 %v2054_v46  ;;  %v3707_v46 = vld [vmem:[%s5620_s5 + $0xd] ss:$0 sm:$0xff] }
 0xaed   : > { %4174 = vmatprep.subr.bf16.mxu0 %v4450_v58  ;;  %4198 = vmatprep.subr.bf16.mxu1 %v4450_v58 }
 0xaef   : > { %4163 = vmatmul.mubr.msk.bf16.vlgmr.msra.gmra.mxu0 %vm672_vm3, %v5169_v2  ;;  %4187 = vmatmul.mubr.msk.bf16.vlgmr.msra.gmra.mxu1 %vm672_vm3, %v5169_v2 }
 0xaf0   : > { %4175 = vmatpush3.bf16.msra.mxu0 %v2053_v48  ;;  %4178 = vmatprep.mubr.msk.bf16.mxu0 %vm4451_vm2, %v4450_v58 }
 0xaf1   : > { %4176 = vmatprep.subr.bf16.mxu0 %v4450_v58  ;;  %4200 = vmatprep.mubr.msk.bf16.mxu1 %vm4451_vm2, %v4450_v58 }
 0xaf4   : > { %4177 = vmatpush3.bf16.msra.mxu0 %v2052_v51 }
 0xaf5   : > { %4190 = vmatprep.subr.bf16.mxu0 %v4450_v58 }
 0xaf7   : > { %4179 = vmatmul.mubr.msk.bf16.vlgmr.msra.gmra.mxu0 %vm672_vm3, %v5169_v2 }
 0xaf8   : > { %4191 = vmatpush3.bf16.msra.mxu0 %v2057_v54  ;;  %4194 = vmatprep.mubr.msk.bf16.mxu0 %vm4451_vm2, %v4450_v58 }
 0xaf9   : > { %4192 = vmatprep.subr.bf16.mxu0 %v4450_v58 }
 0xafc   : > { %4193 = vmatpush3.bf16.msra.mxu0 %v2056_v57 }
 0xafd   : > { %4204 = vmatprep.subr.bf16.mxu0 %v4450_v58 }
 0xaff   : > { %4195 = vmatmul.mubr.msk.bf16.vlgmr.msra.gmra.mxu0 %vm672_vm3, %v5169_v2 }
 0xb00   : > { %4206 = vmatprep.mubr.msk.bf16.mxu0 %vm4451_vm2, %v4450_v58 }
 0xb8f   : > { %v2180_v59 = vpop.f32.mrf.mxu0  ;;  %v2260_v60 = vpop.f32.mrf.mxu1 }
 0xb90   : > { %v2181_v19 = vadd.f32 %v3706_v11, %v2180_v59  ;;  %v2261_v36 = vadd.f32 %v3708_v18, %v2260_v60 }
 0xb91   : > { %v4108_v61 = vpop.f32.mrf.mxu0  ;;  %v4124_v62 = vpop.f32.mrf.mxu1 }
 0xb92   : > { %v2626_v25 = vpack.c.bf16 %v2181_v19, %v2181_v19  ;;  %v2628_v42 = vpack.c.bf16 %v2261_v36, %v2261_v36  ;;  %v3709_v62 = vld [vmem:[%s5620_s5 + $0xf] ss:$0 sm:$0xff] }
 0xb93   : > { %v2183_v63 = vpop.f32.mrf.mxu0  ;;  %v2263_v0 = vpop.f32.mrf.mxu1 }
 0xb95   : > { %v4109_v1 = vpop.f32.mrf.mxu0  ;;  %v4125_v3 = vpop.f32.mrf.mxu1 }
 0xb97   : > { %v2220_v5 = vpop.f32.mrf.mxu0  ;;  %v2340_v6 = vpop.f32.mrf.mxu1 }
 0xb98   : > { %v2341_v7 = vadd.f32 %v3710_v4, %v2340_v6  ;;  %v2221_v53 = vadd.f32 %v3707_v46, %v2220_v5  ;;  %v3715_v5 = vld [vmem:[%s5620_s5 + $0x15] ss:$0 sm:$0xff] }
 0xb99   : > { %v4116_v8 = vpop.f32.mrf.mxu0  ;;  %v4140_v2 = vpop.f32.mrf.mxu1 }
 0xb9a   : > { %v2630_v9 = vpack.c.bf16 %v2341_v7, %v2341_v7  ;;  %v2627_v60 = vpack.c.bf16 %v2221_v53, %v2221_v53 }
 0xb9b   : > { %v2223_v12 = vpop.f32.mrf.mxu0  ;;  %v2343_v13 = vpop.f32.mrf.mxu1 }
 0xb9c   : > { %v2638_v14 = vsel %vm1164_vm4, %v2630_v9, 0 }
 0xb9d   : > { %v4117_v15 = vpop.f32.mrf.mxu0  ;;  %v4141_v16 = vpop.f32.mrf.mxu1  ;;  %4199 = vmatpush3.bf16.xpose.msra.mxu1 %v2638_v14 }
 0xb9e   : > { %4210 = vmatprep.subr.bf16.mxu1 %v4450_v58 }
 0xb9f   : > { %v2300_v20 = vpop.f32.mrf.mxu0  ;;  %v2420_v21 = vpop.f32.mrf.mxu1 }
 0xba0   : > { %v2421_v22 = vadd.f32 %v3712_v17, %v2420_v21  ;;  %v2301_v6 = vadd.f32 %v3709_v62, %v2300_v20 }
 0xba1   : > { %v4132_v23 = vpop.f32.mrf.mxu0  ;;  %v4156_v24 = vpop.f32.mrf.mxu1 }
 0xba2   : > { %v2632_v26 = vpack.c.bf16 %v2421_v22, %v2421_v22  ;;  %v2629_v9 = vpack.c.bf16 %v2301_v6, %v2301_v6 }
 0xba3   : > { %v2303_v28 = vpop.f32.mrf.mxu0  ;;  %v2423_v27 = vpop.f32.mrf.mxu1 }
 0xba4   : > { %v2730_v30 = vsel %vm1164_vm4, %v2632_v26, 0  ;;  %4201 = vmatmul.mubr.msk.bf16.vlgmr.msra.gmra.mxu1 %vm1164_vm4, %v2626_v25 }
 0xba5   : > { %v4133_v31 = vpop.f32.mrf.mxu0  ;;  %v4157_v33 = vpop.f32.mrf.mxu1  ;;  %4211 = vmatpush3.bf16.xpose.msra.mxu1 %v2730_v30  ;;  %4212 = vmatprep.mubr.msk.bf16.mxu1 %vm4451_vm2, %v4450_v58 }
 0xba6   : > { %4222 = vmatprep.subr.bf16.mxu1 %v4450_v58 }
 0xba7   : > { %v2380_v37 = vpop.f32.mrf.mxu0  ;;  %v2500_v38 = vpop.f32.mrf.mxu1 }
 0xba8   : > { %v2381_v32 = vadd.f32 %v3711_v34, %v2380_v37  ;;  %v2501_v39 = vadd.f32 %v3714_v35, %v2500_v38 }
 0xba9   : > { %v4148_v40 = vpop.f32.mrf.mxu0  ;;  %v4172_v41 = vpop.f32.mrf.mxu1 }
 0xbaa   : > { %v2631_v44 = vpack.c.bf16 %v2381_v32, %v2381_v32  ;;  %v2875_v45 = vpack.c.bf16 %v2501_v39, %v2501_v39 }
 0xbab   : > { %v2383_v43 = vpop.f32.mrf.mxu0  ;;  %v2503_v47 = vpop.f32.mrf.mxu1 }
 0xbac   : > { %v2684_v48 = vsel %vm1164_vm4, %v2631_v44, 0  ;;  %v2883_v49 = vand.u32 %v2875_v45, %v4935_v10  ;;  %4213 = vmatmul.mubr.msk.bf16.vlgmr.msra.gmra.mxu1 %vm1164_vm4, %v2628_v42 }
 0xbad   : > { %v4149_v50 = vpop.f32.mrf.mxu0  ;;  %v4173_v51 = vpop.f32.mrf.mxu1  ;;  %4205 = vmatpush3.bf16.xpose.msra.mxu0 %v2684_v48  ;;  %4224 = vmatprep.mubr.msk.bf16.mxu1 %vm4451_vm2, %v4450_v58 }
 0xbae   : > { %4223 = vmatpush3.bf16.msra.mxu1 %v2883_v49  ;;  %4216 = vmatprep.subr.bf16.mxu0 %v4450_v58 }
 0xbaf   : > { %v2460_v54 = vpop.f32.mrf.mxu0  ;;  %v5381_v55 = vpop.f32.mrf.mxu1  ;;  %4234 = vmatprep.subr.bf16.mxu1 %v4450_v58 }
 0xbb0   : > { %v2461_v56 = vadd.f32 %v3713_v52, %v2460_v54 }
 0xbb1   : > { %v4164_v57 = vpop.f32.mrf.mxu0  ;;  %v4188_v59 = vpop.f32.mrf.mxu1 }
 0xbb2   : > { %v2633_v61 = vpack.c.bf16 %v2461_v56, %v2461_v56 }
 0xbb3   : > { %v2463_v63 = vpop.f32.mrf.mxu0  ;;  %v2583_v0 = vpop.f32.mrf.mxu1 }
 0xbb4   : > { %v2776_v1 = vsel %vm1164_vm4, %v2633_v61, 0  ;;  %4207 = vmatmul.mubr.msk.bf16.vlgmr.msra.gmra.mxu0 %vm1164_vm4, %v2627_v60 }
 0xbb5   : > { %v4165_v3 = vpop.f32.mrf.mxu0  ;;  %v4189_v4 = vpop.f32.mrf.mxu1  ;;  %4217 = vmatpush3.bf16.xpose.msra.mxu0 %v2776_v1  ;;  %4218 = vmatprep.mubr.msk.bf16.mxu0 %vm4451_vm2, %v4450_v58 }
 0xbb6   : > { %4228 = vmatprep.subr.bf16.mxu0 %v4450_v58  ;;  %v3716_v4 = vld [vmem:[%s5620_s5 + $0x16] ss:$0 sm:$0xff] }
 0xbb7   : > { %v2540_v7 = vpop.f32.mrf.mxu0  ;;  %v2581_v6 = vadd.f32 %v3716_v4, %v5381_v55 }
 0xbb8   : > { %v2541_v8 = vadd.f32 %v3715_v5, %v2540_v7 }
 0xbb9   : > { %v4180_v2 = vpop.f32.mrf.mxu0 }
 0xbba   : > { %v2876_v11 = vpack.c.bf16 %v2541_v8, %v2541_v8  ;;  %v2877_v8 = vpack.c.bf16 %v2581_v6, %v2581_v6 }
 0xbbb   : > { %v2543_v12 = vpop.f32.mrf.mxu0 }
 0xbbc   : > { %v2929_v13 = vand.u32 %v2876_v11, %v4935_v10  ;;  %4219 = vmatmul.mubr.msk.bf16.vlgmr.msra.gmra.mxu0 %vm1164_vm4, %v2629_v9  ;;  %v2975_v12 = vand.u32 %v2877_v8, %v4935_v10 }
 0xbbd   : > { %v4181_v14 = vpop.f32.mrf.mxu0  ;;  %4230 = vmatprep.mubr.msk.bf16.mxu0 %vm4451_vm2, %v4450_v58 }
 0xbbe   : > { %4229 = vmatpush3.bf16.msra.mxu0 %v2929_v13  ;;  %v3717_v13 = vld [vmem:[%s5620_s5 + $0x17] ss:$0 sm:$0xff] }
 0xbbf   : > { %v5399_v15 = vpop.f32.mrf.mxu0  ;;  %4240 = vmatprep.subr.bf16.mxu0 %v4450_v58 }
 0xbc1   : > { %v4196_v16 = vpop.f32.mrf.mxu0 }
 0xbc3   : > { %v2623_v17 = vpop.f32.mrf.mxu0 }
 0xbc5   : > { %v4197_v19 = vpop.f32.mrf.mxu0 }
 0xbc6   : > { %v2621_v19 = vadd.f32 %v3717_v13, %v5399_v15 }
 0xc64   : > { %v2674_v20 = vpop.f32.mrf.mxu1 }
 0xc65   : > { %v2818_v21 = vmul.f32 0.35355338, %v2674_v20 }
 0xc66   : > { %v4202_v22 = vpop.f32.mrf.mxu1 }
 0xc67   : > { %v2822_v23 = vsel %vm1353_vm7, %v2818_v21, -inf }
 0xc68   : > { %2823 = vmax.xlane.f32.xlu0 %v2822_v23  ;;  %v2677_v24 = vpop.f32.mrf.mxu1 }
 0xc6a   : > { %v4203_v25 = vpop.f32.mrf.mxu1 }
 0xc6c   : > { %v2766_v26 = vpop.f32.mrf.mxu1 }
 0xc6d   : > { %v2820_v18 = vmul.f32 0.35355338, %v2766_v26 }
 0xc6e   : > { %v4214_v28 = vpop.f32.mrf.mxu1 }
 0xc6f   : > { %v2828_v27 = vsel %vm1353_vm7, %v2820_v18, -inf }
 0xc70   : > { %2829 = vmax.xlane.f32.xlu0 %v2828_v27  ;;  %v2769_v30 = vpop.f32.mrf.mxu1  ;;  %v3743_v27 = vld [vmem:[%s5621_s6 + $0x28] sm:$0xff] }
 0xc71   : > { %v3073_v30 = vpack.c.bf16 %v3743_v27, %v3743_v27 }
 0xc72   : > { %v4215_v31 = vpop.f32.mrf.mxu1 }
 0xc73   : > { %v3126_v31 = vsel %vm1614_vm9, %v3073_v30, 0  ;;  %v3753_v30 = vld [vmem:[%s5622_s7 + $0x20] sm:$0xff] }
 0xc74   : > { %v2720_v33 = vpop.f32.mrf.mxu0 }
 0xc75   : > { %v2819_v34 = vmul.f32 0.35355338, %v2720_v33  ;;  %v3744_v33 = vld [vmem:[%s5621_s6 + $0x30] sm:$0xff] }
 0xc76   : > { %v4208_v35 = vpop.f32.mrf.mxu0 }
 0xc77   : > { %v2825_v36 = vsel %vm1353_vm7, %v2819_v34, -inf }
 0xc78   : > { %2826 = vmax.xlane.f32.xlu1 %v2825_v36  ;;  %v2723_v37 = vpop.f32.mrf.mxu0 }
 0xc7a   : > { %v4209_v38 = vpop.f32.mrf.mxu0 }
 0xc7c   : > { %v2812_v32 = vpop.f32.mrf.mxu0 }
 0xc7d   : > { %v2821_v39 = vmul.f32 0.35355338, %v2812_v32 }
 0xc7e   : > { %v4220_v40 = vpop.f32.mrf.mxu0 }
 0xc7f   : > { %v2831_v41 = vsel %vm1353_vm7, %v2821_v39, -inf }
 0xc80   : > { %2832 = vmax.xlane.f32.xlu1 %v2831_v41  ;;  %v2815_v42 = vpop.f32.mrf.mxu0 }
 0xc82   : > { %v4221_v44 = vpop.f32.mrf.mxu0 }
 0xc83   : > { %v3745_v44 = vld [vmem:[%s5621_s6 + $0x38] sm:$0xff] }
 0xcf1   : > { %v2824_v45 = vpop.xlane.xlu0 %2823 }
 0xcf2   : > { %v2834_v46 = vsub.f32 %v2818_v21, %v2824_v45  ;;  %v2878_v21 = vpack.c.bf16 %v2621_v19, %v2621_v19  ;;  %v3750_v19 = vld [vmem:[%s5618_s3 + $0xa] ss:$0 sm:$0xff] }
 0xcf4   : > { %v2838_v43 = vmul.f32 1.442695, %v2834_v46  ;;  %v3021_v24 = vand.u32 %v2878_v21, %v4935_v10  ;;  %v3742_v10 = vld [vmem:[%s5621_s6 + $0x20] sm:$0xff]  ;;  %v3075_v46 = vpack.c.bf16 %v3745_v44, %v3745_v44  ;;  %v3765_v44 = vld [vmem:[%s5623_s8 + $0x70] sm:$0xff] }
 0xcf6   : > { %4365 = vpow2.f32 %v2838_v43 }
 0xcf9   : > { %v2830_v47 = vpop.xlane.xlu0 %2829 }
 0xcfa   : > { %v2836_v48 = vsub.f32 %v2820_v18, %v2830_v47  ;;  %v3072_v18 = vpack.c.bf16 %v3742_v10, %v3742_v10 }
 0xcfc   : > { %v2842_v49 = vmul.f32 1.442695, %v2836_v48  ;;  %v3080_v28 = vsel %vm1614_vm9, %v3072_v18, 0 }
 0xcfe   : > { %4367 = vpow2.f32 %v2842_v49  ;;  %v3218_v49 = vsel %vm1614_vm9, %v3075_v46, 0 }
 0xd01   : > { %v2827_v50 = vpop.xlane.xlu1 %2826 }
 0xd02   : > { %v2835_v51 = vsub.f32 %v2819_v34, %v2827_v50  ;;  %v3074_v34 = vpack.c.bf16 %v3744_v33, %v3744_v33 }
 0xd03   : > { %v4366_v52 = vpop.eup %4365 }
 0xd04   : > { %v2840_v53 = vmul.f32 1.442695, %v2835_v51  ;;  %v2846_v54 = vsel %vm1353_vm7, %v4366_v52, 0.0  ;;  %v3172_v37 = vsel %vm1614_vm9, %v3074_v34, 0 }
 0xd05   : > { %2847 = vadd.xlane.f32.xlu0 %v2846_v54 }
 0xd06   : > { %4369 = vpow2.f32 %v2840_v53 }
 0xd09   : > { %v2833_v56 = vpop.xlane.xlu1 %2832 }
 0xd0a   : > { %v2837_v57 = vsub.f32 %v2821_v39, %v2833_v56 }
 0xd0b   : > { %v4368_v59 = vpop.eup %4367 }
 0xd0c   : > { %v2844_v60 = vmul.f32 1.442695, %v2837_v57  ;;  %v2852_v61 = vsel %vm1353_vm7, %v4368_v59, 0.0 }
 0xd0d   : > { %2853 = vadd.xlane.f32.xlu0 %v2852_v61 }
 0xd0e   : > { %4371 = vpow2.f32 %v2844_v60 }
 0xd13   : > { %v4370_v62 = vpop.eup %4369 }
 0xd14   : > { %v2849_v63 = vsel %vm1353_vm7, %v4370_v62, 0.0 }
 0xd15   : > { %2850 = vadd.xlane.f32.xlu1 %v2849_v63 }
 0xd1b   : > { %v4372_v0 = vpop.eup %4371 }
 0xd1c   : > { %v2855_v1 = vsel %vm1353_vm7, %v4372_v0, 0.0 }
 0xd1d   : > { %2856 = vadd.xlane.f32.xlu1 %v2855_v1 }
 0xd8e   : > { %v2848_v3 = vpop.xlane.xlu0 %2847 }
 0xd8f   : > { %4373 = vrcp.f32 %v2848_v3 }
 0xd96   : > { %v2854_v5 = vpop.xlane.xlu0 %2853 }
 0xd97   : > { %4375 = vrcp.f32 %v2854_v5 }
 0xd9c   : > { %v4374_v7 = vpop.eup %4373 }
 0xd9d   : > { %v2859_v2 = vmul.f32 %v4374_v7, %v4366_v52 }
 0xd9e   : > { %v2851_v9 = vpop.xlane.xlu1 %2850 }
 0xd9f   : > { %4377 = vrcp.f32 %v2851_v9  ;;  %3734 = vst.msk [vmem:[%s4977_s13 + $0x20] sm:$0x1f] %vm1353_vm7, %v2859_v2  ;;  %v2871_v11 = vpack.c.bf16 %v2859_v2, %v2859_v2 }
 0xda1   : > { %4225 = vmatmul.mubr.msk.bf16.vlgmr.msra.gmra.mxu1 %vm1410_vm8, %v2871_v11 }
 0xda2   : > { %4235 = vmatpush3.bf16.msra.mxu1 %v2975_v12  ;;  %4236 = vmatprep.mubr.msk.bf16.mxu1 %vm4451_vm2, %v4450_v58 }
 0xda3   : > { %4246 = vmatprep.subr.bf16.mxu1 %v4450_v58 }
 0xda4   : > { %v4376_v55 = vpop.eup %4375 }
 0xda5   : > { %v2863_v14 = vmul.f32 %v4376_v55, %v4368_v59 }
 0xda6   : > { %v2857_v16 = vpop.xlane.xlu1 %2856 }
 0xda7   : > { %4379 = vrcp.f32 %v2857_v16  ;;  %3736 = vst.msk [vmem:[%s4977_s13 + $0x30] sm:$0x1f] %vm1353_vm7, %v2863_v14  ;;  %v2873_v17 = vpack.c.bf16 %v2863_v14, %v2863_v14 }
 0xda9   : > { %4237 = vmatmul.mubr.msk.bf16.vlgmr.msra.gmra.mxu1 %vm1410_vm8, %v2873_v17 }
 0xdaa   : > { %4248 = vmatprep.mubr.msk.bf16.mxu1 %vm4451_vm2, %v4450_v58  ;;  %4247 = vmatpush3.bf16.msra.mxu1 %v3080_v28  ;;  %v3756_v28 = vld [vmem:[%s5622_s7 + $0x38] sm:$0xff] }
 0xdab   : > { %4258 = vmatprep.subr.bf16.mxu1 %v4450_v58 }
 0xdac   : > { %v4378_v20 = vpop.eup %4377 }
 0xdad   : > { %v2861_v22 = vmul.f32 %v4378_v20, %v4370_v62 }
 0xdaf   : > { %3735 = vst.msk [vmem:[%s4977_s13 + $0x28] sm:$0x1f] %vm1353_vm7, %v2861_v22  ;;  %v2872_v23 = vpack.c.bf16 %v2861_v22, %v2861_v22 }
 0xdb1   : > { %4231 = vmatmul.mubr.msk.bf16.vlgmr.msra.gmra.mxu0 %vm1410_vm8, %v2872_v23 }
 0xdb2   : > { %4241 = vmatpush3.bf16.msra.mxu0 %v3021_v24  ;;  %4242 = vmatprep.mubr.msk.bf16.mxu0 %vm4451_vm2, %v4450_v58 }
 0xdb3   : > { %4252 = vmatprep.subr.bf16.mxu0 %v4450_v58 }
 0xdb4   : > { %v4380_v15 = vpop.eup %4379 }
 0xdb5   : > { %v2865_v25 = vmul.f32 %v4380_v15, %v4372_v0 }
 0xdb7   : > { %3737 = vst.msk [vmem:[%s4977_s13 + $0x38] sm:$0x1f] %vm1353_vm7, %v2865_v25  ;;  %v2874_v26 = vpack.c.bf16 %v2865_v25, %v2865_v25  ;;  %s3507_s13 = sshll.u32 %s379_s14, 4  ;;  %s5576_s13 = int_to_ptr.vmem [resolvable:$true] %s3507_s13 }
 0xdb8   : > { %s4387_s25 = scalar_lea.vmem %s5576_s13, 16  ;;  %p4394_p0 = scmp.lt.s32.totalorder %s5576_s13, %s4392_s30 }
 0xdb9   : > { %4243 = vmatmul.mubr.msk.bf16.vlgmr.msra.gmra.mxu0 %vm1410_vm8, %v2874_v26  ;;  %p4388_p11 = scmp.ne.s32.totalorder %s5576_s13, %s4387_s25  ;;  %p4395_p1 = scmp.lt.s32.totalorder %s4393_s12, %s4387_s25 }
 0xdba   : > { %4254 = vmatprep.mubr.msk.bf16.mxu0 %vm4451_vm2, %v4450_v58  ;;  %4253 = vmatpush3.bf16.msra.mxu0 %v3126_v31  ;;  %v3754_v31 = vld [vmem:[%s5622_s7 + $0x28] sm:$0xff] }
 0xdbb   : > { %4264 = vmatprep.subr.bf16.mxu0 %v4450_v58  ;;  %v3302_v33 = vpack.c.bf16 %v3754_v31, %v3753_v30  ;;  %p4389_p12 = pnand %p4388_p11, %p4552_p5  ;;  %p4396_p2 = por %p4395_p1, %p4394_p0 }
 0xdbd   : > { %p4390_p13 = pneg %p4389_p12 }
 0xdbf   : > { %p4397_p3 = pnand %p4396_p2, %p4390_p13 }
 0xe61   : > { %v2919_v35 = vpop.f32.mrf.mxu1 }
 0xe62   : > { %v3063_v36 = vpack.c.bf16 %v2919_v35, %v2919_v35 }
 0xe63   : > { %v4226_v38 = vpop.f32.mrf.mxu1 }
 0xe64   : > { %4249 = vmatmul.mubr.msk.bf16.vlgmr.msra.gmra.mxu1 %vm1164_vm4, %v3063_v36  ;;  %v3751_v38 = vld [vmem:[%s5618_s3 + $0xb] ss:$0 sm:$0xff] }
 0xe65   : > { %v2922_v32 = vpop.f32.mrf.mxu1  ;;  %4259 = vmatpush3.bf16.msra.mxu1 %v3172_v37  ;;  %4260 = vmatprep.mubr.msk.bf16.mxu1 %vm4451_vm2, %v4450_v58 }
 0xe66   : > { %4270 = vmatprep.subr.bf16.mxu1 %v4450_v58 }
 0xe67   : > { %v4227_v39 = vpop.f32.mrf.mxu1 }
 0xe68   : > { %v3752_v39 = vld [vmem:[%s5618_s3 + $0xc] ss:$0 sm:$0xff] }
 0xe69   : > { %v3011_v40 = vpop.f32.mrf.mxu1 }
 0xe6a   : > { %v3065_v41 = vpack.c.bf16 %v3011_v40, %v3011_v40 }
 0xe6b   : > { %v4238_v42 = vpop.f32.mrf.mxu1 }
 0xe6c   : > { %4261 = vmatmul.mubr.msk.bf16.vlgmr.msra.gmra.mxu1 %vm1164_vm4, %v3065_v41 }
 0xe6d   : > { %v3014_v45 = vpop.f32.mrf.mxu1  ;;  %4274 = vmatprep.mubr.msk.bf16.mxu1 %vm4451_vm2, %v4450_v58 }
 0xe6e   : > { %v3766_v45 = vld [vmem:[%s5623_s8 + $0x78] sm:$0xff] }
 0xe6f   : > { %v4239_v43 = vpop.f32.mrf.mxu1  ;;  %v3369_v46 = vpack.c.bf16 %v3766_v45, %v3765_v44 }
 0xe70   : > { %v3763_v43 = vld [vmem:[%s5623_s8 + $0x60] sm:$0xff] }
 0xe71   : > { %v2965_v47 = vpop.f32.mrf.mxu0 }
 0xe72   : > { %v3064_v48 = vpack.c.bf16 %v2965_v47, %v2965_v47  ;;  %v3764_v47 = vld [vmem:[%s5623_s8 + $0x68] sm:$0xff] }
 0xe73   : > { %v4232_v50 = vpop.f32.mrf.mxu0 }
 0xe74   : > { %4255 = vmatmul.mubr.msk.bf16.vlgmr.msra.gmra.mxu0 %vm1164_vm4, %v3064_v48  ;;  %v3368_v48 = vpack.c.bf16 %v3764_v47, %v3763_v43  ;;  %v3762_v50 = vld [vmem:[%s5623_s8 + $0x58] sm:$0xff] }
 0xe75   : > { %v2968_v51 = vpop.f32.mrf.mxu0  ;;  %4265 = vmatpush3.bf16.msra.mxu0 %v3218_v49  ;;  %4266 = vmatprep.mubr.msk.bf16.mxu0 %vm4451_vm2, %v4450_v58  ;;  %v3761_v49 = vld [vmem:[%s5623_s8 + $0x50] sm:$0xff] }
 0xe76   : > { %4278 = vmatprep.subr.bf16.mxu0 %v4450_v58  ;;  %v3367_v51 = vpack.c.bf16 %v3762_v50, %v3761_v49 }
 0xe77   : > { %v4233_v52 = vpop.f32.mrf.mxu0 }
 0xe78   : > { %v3759_v52 = vld [vmem:[%s5623_s8 + $0x40] sm:$0xff] }
 0xe79   : > { %v3057_v53 = vpop.f32.mrf.mxu0 }
 0xe7a   : > { %v3066_v54 = vpack.c.bf16 %v3057_v53, %v3057_v53  ;;  %v3760_v53 = vld [vmem:[%s5623_s8 + $0x48] sm:$0xff] }
 0xe7b   : > { %v4244_v56 = vpop.f32.mrf.mxu0 }
 0xe7c   : > { %4267 = vmatmul.mubr.msk.bf16.vlgmr.msra.gmra.mxu0 %vm1164_vm4, %v3066_v54  ;;  %v3366_v54 = vpack.c.bf16 %v3760_v53, %v3759_v52  ;;  %v3757_v56 = vld [vmem:[%s5618_s3 + $0xd] ss:$0 sm:$0xff] }
 0xe7d   : > { %v3060_v57 = vpop.f32.mrf.mxu0  ;;  %4286 = vmatprep.mubr.msk.bf16.mxu0 %vm4451_vm2, %v4450_v58  ;;  %4279 = vmatpush3.bf16.msra.mxu0 %v3369_v46 }
 0xe7e   : > { %4280 = vmatprep.subr.bf16.mxu0 %v4450_v58 }
 0xe7f   : > { %v4245_v59 = vpop.f32.mrf.mxu0 }
 0xe81   : > { %4281 = vmatpush3.bf16.msra.mxu0 %v3368_v48 }
 0xe82   : > { %4282 = vmatprep.subr.bf16.mxu0 %v4450_v58 }
 0xe85   : > { %4283 = vmatpush3.bf16.msra.mxu0 %v3367_v51 }
 0xe86   : > { %4284 = vmatprep.subr.bf16.mxu0 %v4450_v58 }
 0xe89   : > { %4285 = vmatpush3.bf16.msra.mxu0 %v3366_v54 }
 0xf24   : > { %v3116_v60 = vpop.f32.mrf.mxu1 }
 0xf25   : > { %v3260_v8 = vsel %vm490_vm1, %v3116_v60, 0.0 }
 0xf26   : > { %v4250_v61 = vpop.f32.mrf.mxu1 }
 0xf28   : > { %v3119_v62 = vpop.f32.mrf.mxu1 }
 0xf2a   : > { %v4251_v63 = vpop.f32.mrf.mxu1 }
 0xf2c   : > { %v3208_v0 = vpop.f32.mrf.mxu1 }
 0xf2d   : > { %v3263_v12 = vsel %vm490_vm1, %v3208_v0, 0.0 }
 0xf2e   : > { %v4262_v1 = vpop.f32.mrf.mxu1 }
 0xf30   : > { %v3211_v3 = vpop.f32.mrf.mxu1 }
 0xf32   : > { %v4263_v4 = vpop.f32.mrf.mxu1 }
 0xf34   : > { %v3162_v5 = vpop.f32.mrf.mxu0 }
 0xf35   : > { %v3261_v6 = vsel %vm490_vm1, %v3162_v5, 0.0 }
 0xf36   : > { %v4256_v7 = vpop.f32.mrf.mxu0  ;;  %v3262_v2 = vadd.f32 %v3261_v6, %v3260_v8 }
 0xf37   : > { %v3768_v7 = vld [vmem:[%s5618_s3 + $0xe] ss:$0 sm:$0xff] }
 0xf38   : > { %v3165_v9 = vpop.f32.mrf.mxu0  ;;  %v3264_v13 = vadd.f32 %v3263_v12, %v3262_v2 }
 0xf3a   : > { %v4257_v11 = vpop.f32.mrf.mxu0 }
 0xf3c   : > { %v3254_v55 = vpop.f32.mrf.mxu0 }
 0xf3d   : > { %v3265_v14 = vsel %vm490_vm1, %v3254_v55, 0.0 }
 0xf3e   : > { %v3266_v16 = vadd.f32 %v3265_v14, %v3264_v13  ;;  %v4268_v17 = vpop.f32.mrf.mxu0 }
 0xf40   : > { %v3267_v20 = vadd.f32 %v3266_v16, %v5114_v29  ;;  %v3257_v21 = vpop.f32.mrf.mxu0  ;;  %v3755_v29 = vld [vmem:[%s5622_s7 + $0x30] sm:$0xff] }
 0xf41   : > { %v3303_v27 = vpack.c.bf16 %v3756_v28, %v3755_v29  ;;  %v3442_v21 = vld [vmem:[%s5624_s9 + $0x18] sm:$0xff]  ;;  %v3419_v29 = vld [vmem:[%s5618_s3 + $0x10] sm:$0x1] }
 0xf42   : > { %v4269_v22 = vpop.f32.mrf.mxu0  ;;  %v5482_v23 = vadd.f32 %v3750_v19, %v3267_v20  ;;  %v3441_v20 = vld [vmem:[%s5624_s9 + $0x10] sm:$0xff] }
 0xf43   : > { %4271 = vmatpush3.bf16.msra.mxu1 %v3303_v27  ;;  %v3444_v22 = vpack.c.bf16 %v3442_v21, %v3441_v20  ;;  %v3420_v27 = vld [vmem:[%s5618_s3 + $0x11] sm:$0x1] }
 0xf44   : > { %v3273_v24 = vsel %vm490_vm1, %v5482_v23, 0.0  ;;  %4272 = vmatprep.subr.bf16.mxu1 %v4450_v58 }
 0xf45   : > { %3274 = vadd.xlane.f32.xlu0 %v3273_v24  ;;  %v3440_v24 = vld [vmem:[%s5624_s9 + $0x8] sm:$0xff] }
 0xf47   : > { %4273 = vmatpush3.bf16.msra.mxu1 %v3302_v33  ;;  %v3437_v33 = vld [vmem:[%s5618_s3 + $0x12] sm:$0x1] }
 0xf48   : > { %4290 = vmatprep.subr.bf16.mxu1 %v4450_v58 }
 0xfce   : > { %v3275_v15 = vpop.xlane.xlu0 %3274 }
 0xfcf   : > { %v3276_v25 = vmul.f32 0.03125, %v3275_v15 }
 0xfd1   : > { %v3277_v26 = vsub.f32 %v5482_v23, %v3276_v25 }
 0xfd3   : > { %v3278_v10 = vmul.f32 %v3277_v26, %v3277_v26 }
 0xfd5   : > { %v3279_v18 = vsel %vm490_vm1, %v3278_v10, 0.0 }
 0xfd6   : > { %3280 = vadd.xlane.f32.xlu1 %v3279_v18 }
0x105f   : > { %v3281_v34 = vpop.xlane.xlu1 %3280 }
0x1060   : > { %v3282_v35 = vmul.f32 0.03125, %v3281_v34 }
0x1062   : > { %v3283_v36 = vadd.f32 1e-12, %v3282_v35 }
0x1064   : > { %4381 = vrsqrt.f32 %v3283_v36 }
0x1071   : > { %v4382_v37 = vpop.eup %4381 }
0x1072   : > { %v3285_v32 = vmul.f32 %v4382_v37, %v3277_v26 }
0x1074   : > { %v3290_v40 = vmul.f32 %v3751_v38, %v3285_v32 }
0x1076   : > { %v3295_v41 = vadd.f32 %v3752_v39, %v3290_v40 }
0x1078   : > { %v3296_v42 = vpack.c.bf16 %v3295_v41, %v3295_v41 }
0x107a   : > { %4275 = vmatmul.mubr.msk.bf16.vlgmr.msra.gmra.mxu1 %vm672_vm3, %v3296_v42 }
0x107b   : > { %4294 = vmatprep.mubr.msk.bf16.mxu1 %vm4451_vm2, %v4450_v58  ;;  %4291 = vmatpush3.bf16.msra.mxu1 %v3444_v22 }
0x107c   : > { %4292 = vmatprep.subr.bf16.mxu1 %v4450_v58 }
0x113a   : > { %v3345_v57 = vpop.f32.mrf.mxu1 }
0x113b   : > { %v3346_v59 = vadd.f32 %v3757_v56, %v3345_v57 }
0x113c   : > { %v4276_v60 = vpop.f32.mrf.mxu1 }
0x113d   : > { %v3352_v61 = vmul.f32 0.70710677, %v3346_v59  ;;  %v3351_v1 = vmul.f32 0.5, %v3346_v59 }
0x113e   : > { %v3348_v62 = vpop.f32.mrf.mxu1 }
0x113f   : > { %4383 = verf.f32 %v3352_v61 }
0x1140   : > { %v4277_v63 = vpop.f32.mrf.mxu1 }
0x114c   : > { %v4384_v0 = vpop.eup %4383 }
0x114d   : > { %v3354_v3 = vadd.f32 1.0, %v4384_v0 }
0x114f   : > { %v3355_v4 = vmul.f32 %v3354_v3, %v3351_v1 }
0x1151   : > { %v3356_v5 = vpack.c.bf16 %v3355_v4, %v3355_v4 }
0x1153   : > { %4287 = vmatmul.mubr.msk.bf16.vlgmr.msra.gmra.mxu0 %vm439_vm0, %v3356_v5 }
0x1213   : > { %v3407_v6 = vpop.f32.mrf.mxu0 }
0x1214   : > { %v3413_v8 = vadd.f32 %v3407_v6, %v5482_v23  ;;  %v3439_v23 = vld [vmem:[%s5624_s9] sm:$0xff] }
0x1215   : > { %v4288_v2 = vpop.f32.mrf.mxu0  ;;  %v3443_v15 = vpack.c.bf16 %v3440_v24, %v3439_v23 }
0x1216   : > { %v3418_v9 = vadd.f32 %v3768_v7, %v3413_v8 }
0x1217   : > { %v3410_v11 = vpop.f32.mrf.mxu0  ;;  %4293 = vmatpush3.bf16.msra.mxu1 %v3443_v15 }
0x1218   : > { %v3422_v12 = vsel %vm3421_vm10, %v3418_v9, 0.0 }
0x1219   : > { %3423 = vadd.xlane.f32.xlu0 %v3422_v12  ;;  %v4289_v55 = vpop.f32.mrf.mxu0 }
0x12a2   : > { %v3424_v13 = vpop.xlane.xlu0 %3423 }
0x12a3   : > { %v3425_v14 = vmul.f32 0.03125, %v3424_v13 }
0x12a5   : > { %v3426_v16 = vsub.f32 %v3418_v9, %v3425_v14 }
0x12a7   : > { %v3427_v17 = vmul.f32 %v3426_v16, %v3426_v16 }
0x12a9   : > { %v3428_v19 = vsel %vm3421_vm10, %v3427_v17, 0.0 }
0x12aa   : > { %3429 = vadd.xlane.f32.xlu1 %v3428_v19 }
0x1333   : > { %v3430_v25 = vpop.xlane.xlu1 %3429 }
0x1334   : > { %v3431_v26 = vmul.f32 0.03125, %v3430_v25 }
0x1336   : > { %v3432_v10 = vadd.f32 1e-12, %v3431_v26 }
0x1338   : > { %4385 = vrsqrt.f32 %v3432_v10 }
0x1345   : > { %v4386_v18 = vpop.eup %4385 }
0x1346   : > { %v3434_v28 = vmul.f32 %v4386_v18, %v3426_v16 }
0x1348   : > { %v3435_v30 = vmul.f32 %v3434_v28, %v3419_v29 }
0x134a   : > { %v3436_v31 = vadd.f32 %v3435_v30, %v3420_v27 }
0x134c   : > { %v3438_v58 = vpack.c.bf16 %v3436_v31, %v3436_v31 }
0x134e   : > { %4295 = vmatmul.mubr.msk.bf16.vlgmr.msra.gmra.mxu1 %vm672_vm3, %v3438_v58 }
0x140e   : > { %v3482_v34 = vpop.f32.mrf.mxu1 }
0x140f   : > { %v3483_v35 = vadd.f32 %v3482_v34, %v3437_v33 }
0x1410   : > { %v4296_v36 = vpop.f32.mrf.mxu1 }
0x1411   : > { %3488 = vst [vmem:[%s379_s14] sm:$0x1] %v3483_v35 }
0x1412   : > { %v3485_v37 = vpop.f32.mrf.mxu1 }
0x1413   : > { %4400 = shalt.err (!%p4397_p3)
}
0x1414   : > { %s4401_s26 = scalar_lea.hbm %s5574_s22, 16  ;;  %s4405_s24 = scalar_lea.hbm %s5625_s10, 32 }
0x1415   : > { %p4402_p4 = scmp.ne.s32.totalorder %s5574_s22, %s4401_s26  ;;  %p4406_p9 = scmp.lt.s32.totalorder %s5574_s22, %s5625_s10 }
0x1416   : > { %p4407_p10 = scmp.lt.s32.totalorder %s4405_s24, %s4401_s26 }
0x1417   : > { %p4403_p7 = pnand %p4402_p4, %p4552_p5 }
0x1418   : > { %p4408_p11 = por %p4407_p10, %p4406_p9 }
0x1419   : > { %p4404_p8 = pneg %p4403_p7 }
0x141b   : > { %p4409_p12 = pnand %p4408_p11, %p4404_p8 }
0x141d   : > { %4412 = shalt.err (!%p4409_p12)
}
0x141e   : > { %4298 = dma.vmem_to_hbm [thread:$0]  (%p4552_p5), %s5576_s13, 16, %s5574_s22, %s3490_s16   ;;  %v4297_v38 = vpop.f32.mrf.mxu1 }
0x141f PF: > { %p4304_p13 = scmp.ge.s32.totalorder %s4447_s20, 2  ;;  %s3522_s25 = sand.u32 1, %s4435_s17  }
0x1420   : > { %s3523_s30 = scalar_lea.sflag [#allocation3], %s3522_s25 }
0x1421   : > { %p4301_p0 = pnand %p4304_p13, %p4556_p6 }
0x1423   : > { %p4302_p1 = pneg %p4301_p0 }
0x1425   : > { %4430 = dma.done.wait (%p4302_p1), %s3523_s30, 16  }
0x1426   : > { %4432 = vsyncadd (%p4302_p1), %s3523_s30, 4294967280  ;;  %s5630_s27 = sld [smem:[#allocation5_spill]]  ;;  %p22_p2 = scmp.ge.s32.totalorder %s4539_s23, 4  }
0x1427   : > { %s5631_s17 = smov %s4439_s18  ;;  %s5632_s18 = smov %s4443_s19 }
0x1428   : > { %s5634_s20 = smov %s4539_s23  ;;  %24 = sbr.rel (!%p22_p2) target bundleno = 3 (0x3), region = 113 }
0x142c   : > { %s5633_s19 = smov %s5630_s27 }
0x142d   :  { %3535 = vsyncpa [#allocation3], 1 }
0x142e   :  { %3537 = vsyncpa [#allocation3 + $0x1], 1 }

</bundles_post_ra>
